<compile_context>
chip_gen: v5e
topology: v5e:2x2
jax: 0.10.0
libtpu: 0.0.40
codegen_flags: <defaults>
</compile_context>

<pallas_src>
import functools

import jax
import jax.numpy as jnp
from jax.experimental import pallas as pl
from jax.experimental.pallas import tpu as pltpu


_LANE = 128
_VMEM_LIMIT = 32 * 1024 * 1024            # scoped-VMEM request (safe on v5e/v6e/v7x)
_VMEM_WORKSET_BUDGET = 12 * 1024 * 1024   # target double-buffered working set


def _round_up(x, m):
    return (x + m - 1) // m * m


def _pick_tile_n(npad, bytes_per_col, min_steps=8):
    """Largest lane tile (multiple of 128) whose double-buffered working set fits the
    VMEM budget, preferring >= min_steps grid steps (keeps v7x's 2 TCs / pipeline fed)."""
    cands = [t for t in (2048, 1024, 512, 256, 128)
             if npad % t == 0 and 2 * t * bytes_per_col <= _VMEM_WORKSET_BUDGET]
    if not cands:
        return 128
    deep = [t for t in cands if npad // t >= min_steps]
    return deep[0] if deep else cands[-1]


# ----------------------------- Pallas kernels ------------------------------


def _conv_stats_kernel(*refs, n_ops, n_valid, tile_n, npad):
    """y = sum_i W_i @ P_i + bias on a lane-dense (Cout, TN) tile, fused with
    per-channel sum / sum-of-squares accumulated across the N grid axis."""
    p_refs = refs[:n_ops]
    w_refs = refs[n_ops:2 * n_ops]
    b_ref = refs[2 * n_ops]
    o_ref, sum_ref, sq_ref = refs[2 * n_ops + 1:2 * n_ops + 4]

    @pl.when(pl.program_id(0) == 0)
    def _():
        sum_ref[...] = jnp.zeros_like(sum_ref)
        sq_ref[...] = jnp.zeros_like(sq_ref)

    acc = jnp.zeros(o_ref.shape, jnp.float32)
    for p_ref, w_ref in zip(p_refs, w_refs):
        # bf16 x bf16 MXU matmul, f32 accumulation; K = 27*Cin (folded taps).
        acc += jnp.dot(w_ref[...], p_ref[...], preferred_element_type=jnp.float32)
    y = acc + b_ref[...]

    if npad != n_valid:
        # Zero the pad columns so they do not bias the BN statistics.
        col = pl.program_id(0) * tile_n + jax.lax.broadcasted_iota(
            jnp.int32, (1, tile_n), 1)
        y = jnp.where(col < n_valid, y, 0.0)

    o_ref[...] = y.astype(o_ref.dtype)
    sum_ref[...] += jnp.sum(y, axis=1, keepdims=True)
    sq_ref[...] += jnp.sum(y * y, axis=1, keepdims=True)


def _affine_act_kernel(x_ref, scale_ref, shift_ref, o_ref, *, act, n_valid,
                       tile_n, npad):
    """Fused BatchNorm affine (precomputed scale/shift) + activation, lane-dense."""
    y = x_ref[...].astype(jnp.float32) * scale_ref[...] + shift_ref[...]
    if act == "relu":
        y = jnp.maximum(y, 0.0)
    elif act == "mish":
        # mish(y) = y * tanh(softplus(y)), numerically stable softplus.
        sp = jnp.maximum(y, 0.0) + jnp.log(1.0 + jnp.exp(-jnp.abs(y)))
        y = y * jnp.tanh(sp)
    else:
        raise ValueError(act)
    if npad != n_valid:
        col = pl.program_id(0) * tile_n + jax.lax.broadcasted_iota(
            jnp.int32, (1, tile_n), 1)
        y = jnp.where(col < n_valid, y, 0.0)
    o_ref[...] = y.astype(o_ref.dtype)


# ------------------------------ pallas_call wrappers ------------------------


def conv_stats_pallas(patch_list, weight_list, bias, n_valid):
    """patch_list: list of (K_i, Npad) bf16; weight_list: list of (Cout, K_i);
    bias: (Cout, 1) f32.  Returns (y (Cout, Npad) f32, sum (Cout,1), sumsq (Cout,1))."""
    n_ops = len(patch_list)
    cout = weight_list[0].shape[0]
    npad = patch_list[0].shape[1]
    weight_list = [w.astype(jnp.bfloat16) for w in weight_list]

    bytes_per_col = sum(p.shape[0] * p.dtype.itemsize for p in patch_list) + cout * 4
    tn = _pick_tile_n(npad, bytes_per_col)

    in_specs = []
    for p in patch_list:
        in_specs.append(pl.BlockSpec((p.shape[0], tn), lambda i: (0, i)))
    for w in weight_list:
        in_specs.append(pl.BlockSpec((cout, w.shape[1]), lambda i: (0, 0)))
    in_specs.append(pl.BlockSpec((cout, 1), lambda i: (0, 0)))          # bias

    kern = functools.partial(_conv_stats_kernel, n_ops=n_ops, n_valid=n_valid,
                             tile_n=tn, npad=npad)
    return pl.pallas_call(
        kern,
        out_shape=(
            jax.ShapeDtypeStruct((cout, npad), jnp.float32),
            jax.ShapeDtypeStruct((cout, 1), jnp.float32),
            jax.ShapeDtypeStruct((cout, 1), jnp.float32),
        ),
        grid=(npad // tn,),
        in_specs=in_specs,
        out_specs=(
            pl.BlockSpec((cout, tn), lambda i: (0, i)),
            pl.BlockSpec((cout, 1), lambda i: (0, 0)),   # resident accumulators
            pl.BlockSpec((cout, 1), lambda i: (0, 0)),
        ),
        compiler_params=pltpu.CompilerParams(
            dimension_semantics=("arbitrary",),          # stats reduce over N axis
            vmem_limit_bytes=_VMEM_LIMIT,
        ),
    )(*patch_list, *weight_list, bias)


def affine_act_pallas(x_cn, scale, shift, act, n_valid, out_dtype):
    """x_cn: (C, Npad); scale/shift: (C, 1).  Lane-dense BN affine + activation."""
    c, npad = x_cn.shape
    bytes_per_col = c * (x_cn.dtype.itemsize + jnp.dtype(out_dtype).itemsize)
    tn = _pick_tile_n(npad, bytes_per_col)
    kern = functools.partial(_affine_act_kernel, act=act, n_valid=n_valid,
                             tile_n=tn, npad=npad)
    return pl.pallas_call(
        kern,
        out_shape=jax.ShapeDtypeStruct((c, npad), out_dtype),
        grid=(npad // tn,),
        in_specs=[
            pl.BlockSpec((c, tn), lambda i: (0, i)),
            pl.BlockSpec((c, 1), lambda i: (0, 0)),
            pl.BlockSpec((c, 1), lambda i: (0, 0)),
        ],
        out_specs=pl.BlockSpec((c, tn), lambda i: (0, i)),
        compiler_params=pltpu.CompilerParams(
            dimension_semantics=("parallel",),
            vmem_limit_bytes=_VMEM_LIMIT,
        ),
    )(x_cn, scale, shift)


# ------------------------------- module glue --------------------------------


def im2col_cn(a_sp, dil, npad):
    """a_sp: (C, B, D, H, W) channel-first.  Returns the folded (27*C, Npad) bf16
    patch matrix (rows tap-major, then channel) for 3x3x3, stride 1, pad=dilation."""
    c, b, d, h, w = a_sp.shape
    p = dil
    ap = jnp.pad(a_sp, ((0, 0), (0, 0), (p, p), (p, p), (p, p)))
    n = b * d * h * w
    taps = []
    for kd in range(3):
        for kh in range(3):
            for kw in range(3):
                t = ap[:, :, kd * dil:kd * dil + d,
                             kh * dil:kh * dil + h,
                             kw * dil:kw * dil + w]
                taps.append(t.reshape(c, n))
    pat = jnp.concatenate(taps, axis=0)                 # (27*C, N), row = t*C + c
    if npad != n:
        pat = jnp.pad(pat, ((0, 0), (0, npad - n)))
    return pat.astype(jnp.bfloat16)


def bn_affine_act(y, s, sq, gamma, beta, n_valid, act, out_dtype, eps=1e-5):
    """Training-mode BatchNorm (batch stats, biased var) folded into scale/shift,
    then the fused affine+activation Pallas pass."""
    inv_n = 1.0 / n_valid
    mean = s * inv_n
    var = jnp.maximum(sq * inv_n - mean * mean, 0.0)    # clamp guards cancellation
    scale = gamma[:, None] * jax.lax.rsqrt(var + eps)
    shift = beta[:, None] - mean * scale
    return affine_act_pallas(y, scale, shift, act, n_valid, out_dtype)


def dual_dilated_block_forward(x_ncdhw, params):
    # NCDHW -> channel-first spatial (Cin, B, D, H, W)
    x = jnp.transpose(x_ncdhw, (1, 0, 2, 3, 4)).astype(jnp.float32)
    _, b, d, h, w = x.shape
    n = b * d * h * w
    npad = _round_up(n, _LANE)

    def conv_bn_act(a_sp, wf, bias, gamma, beta, dil, act, out_dtype):
        pat = im2col_cn(a_sp, dil, npad)
        y, s, sq = conv_stats_pallas([pat], [wf], bias, n)   # conv + fused BN stats
        return bn_affine_act(y, s, sq, gamma, beta, n, act, out_dtype)

    def branch(p, dil, act):
        a1 = conv_bn_act(x, p["w1"], p["b1"], p["g1"], p["be1"], dil, act,
                         jnp.float32)                        # (Cout, Npad) f32
        a1_sp = a1[:, :n].reshape(a1.shape[0], b, d, h, w)
        # Final branch activation stored bf16 -> feeds the fuse matmul directly.
        return conv_bn_act(a1_sp, p["w2"], p["b2"], p["g2"], p["be2"], dil, act,
                           jnp.bfloat16)

    x3 = branch(params["c3"], 1, "mish")   # conv_block_3:        BN + Mish
    x5 = branch(params["c5"], 2, "relu")   # dilated_conv_block_5: BN + ReLU
    x7 = branch(params["c7"], 3, "relu")   # dilated_conv_block_7: BN + ReLU

    # 1x1x1 fuse conv: three accumulated dots, no HBM concat of (N, 3*Cout).
    f = params["fuse"]
    y, s, sq = conv_stats_pallas([x3, x5, x7], [f["w3"], f["w5"], f["w7"]],
                                 f["b"], n)
    out = bn_affine_act(y, s, sq, f["g"], f["be"], n, "relu", jnp.float32)

    cout = out.shape[0]
    out = out[:, :n].reshape(cout, b, d, h, w)
    return jnp.transpose(out, (1, 0, 2, 3, 4))          # -> NCDHW


# ------------------------------- parameters ---------------------------------


def init_params(key, ch_in, ch_out):
    # Conv weights stored pre-folded: (Cout, taps*Cin), row index = tap*Cin + cin
    # (a torch (Cout,Cin,3,3,3) weight folds via transpose to (Cout,3,3,3,Cin)).
    def conv_params(k, cin, cout, taps):
        bound = 1.0 / (cin * taps) ** 0.5               # PyTorch-style uniform bound
        kw_, kb = jax.random.split(k)
        wgt = jax.random.uniform(kw_, (cout, taps * cin), jnp.float32, -bound, bound)
        bvec = jax.random.uniform(kb, (cout, 1), jnp.float32, -bound, bound)
        return wgt, bvec

    def branch_params(k, cin, cout):
        k1, k2 = jax.random.split(k)
        w1, b1 = conv_params(k1, cin, cout, 27)
        w2, b2 = conv_params(k2, cout, cout, 27)
        return dict(
            w1=w1, b1=b1, w2=w2, b2=b2,
            g1=jnp.ones((cout,), jnp.float32), be1=jnp.zeros((cout,), jnp.float32),
            g2=jnp.ones((cout,), jnp.float32), be2=jnp.zeros((cout,), jnp.float32),
        )

    k3, k5, k7, kf = jax.random.split(key, 4)
    wf, bf = conv_params(kf, ch_out * 3, ch_out, 1)     # (Cout, 3*Cout)
    return dict(
        c3=branch_params(k3, ch_in, ch_out),
        c5=branch_params(k5, ch_in, ch_out),
        c7=branch_params(k7, ch_in, ch_out),
        fuse=dict(
            w3=wf[:, :ch_out], w5=wf[:, ch_out:2 * ch_out], w7=wf[:, 2 * ch_out:],
            b=bf,
            g=jnp.ones((ch_out,), jnp.float32),
            be=jnp.zeros((ch_out,), jnp.float32),
        ),
    )


# --------------------------------- main --------------------------------------


if __name__ == "__main__":
    key = jax.random.PRNGKey(0)
    kx, kp = jax.random.split(key)

    B, CH_IN, D, H, W = 2, 4, 8, 8, 8
    CH_OUT = 8

    x = jax.random.normal(kx, (B, CH_IN, D, H, W), jnp.float32)   # NCDHW like PyTorch
    params = init_params(kp, CH_IN, CH_OUT)

    fwd = jax.jit(dual_dilated_block_forward)
    out = fwd(x, params)
    jax.block_until_ready(out)

    assert out.shape == (B, CH_OUT, D, H, W), out.shape
    assert bool(jnp.all(jnp.isfinite(out)))
    print("KERNEL_OK")
</pallas_src>

<mosaic_0001>
module attributes {stable_mosaic.version = 11 : i64} {
  func.func @_conv_stats_kernel(%arg0: i32, %arg1: memref<108x128xbf16, #tpu.memory_space<vmem>>, %arg2: memref<8x108xbf16, #tpu.memory_space<vmem>>, %arg3: memref<8x1xf32, #tpu.memory_space<vmem>>, %arg4: memref<8x128xf32, #tpu.memory_space<vmem>>, %arg5: memref<8x1xf32, #tpu.memory_space<vmem>>, %arg6: memref<8x1xf32, #tpu.memory_space<vmem>>) attributes {dimension_semantics = [#tpu.dimension_semantics<arbitrary>], iteration_bounds = array<i64: 8>, scalar_prefetch = 0 : i64, scratch_operands = 0 : i64, tpu.core_type = #tpu.core_type<tc>, window_params = [{transform_indices = @transform_0, window_bounds = array<i64: 108, 128>}, {pipeline_mode = #tpu.pipeline_mode<synchronous>, transform_indices = @transform_1, window_bounds = array<i64: 8, 108>}, {pipeline_mode = #tpu.pipeline_mode<synchronous>, transform_indices = @transform_2, window_bounds = array<i64: 8, 1>}, {transform_indices = @transform_3, window_bounds = array<i64: 8, 128>}, {pipeline_mode = #tpu.pipeline_mode<synchronous>, transform_indices = @transform_4, window_bounds = array<i64: 8, 1>}, {pipeline_mode = #tpu.pipeline_mode<synchronous>, transform_indices = @transform_5, window_bounds = array<i64: 8, 1>}]} {
    %c0_i32 = arith.constant 0 : i32
    %0 = arith.cmpi eq, %arg0, %c0_i32 : i32
    %1 = arith.extui %0 : i1 to i32
    %c0_i32_0 = arith.constant 0 : i32
    %2 = arith.cmpi ne, %1, %c0_i32_0 : i32
    scf.if %2 {
      %cst_19 = arith.constant 0.000000e+00 : f32
      %23 = vector.broadcast %cst_19 : f32 to vector<8x1xf32>
      %c0_20 = arith.constant 0 : index
      %c0_21 = arith.constant 0 : index
      %24 = vector.load %arg5[%c0_20, %c0_21] : memref<8x1xf32, #tpu.memory_space<vmem>>, vector<8x1xf32>
      tpu.vector_store %arg5[%c0_20, %c0_21], %23 {strides = array<i32>} : memref<8x1xf32, #tpu.memory_space<vmem>>, vector<8x1xf32>,
      %cst_22 = arith.constant 0.000000e+00 : f32
      %25 = vector.broadcast %cst_22 : f32 to vector<8x1xf32>
      %c0_23 = arith.constant 0 : index
      %c0_24 = arith.constant 0 : index
      %26 = vector.load %arg6[%c0_23, %c0_24] : memref<8x1xf32, #tpu.memory_space<vmem>>, vector<8x1xf32>
      tpu.vector_store %arg6[%c0_23, %c0_24], %25 {strides = array<i32>} : memref<8x1xf32, #tpu.memory_space<vmem>>, vector<8x1xf32>,
    } else {
    }
    %cst = arith.constant 0.000000e+00 : f32
    %3 = vector.broadcast %cst : f32 to vector<8x128xf32>
    %c0 = arith.constant 0 : index
    %c0_1 = arith.constant 0 : index
    %4 = vector.load %arg2[%c0, %c0_1] : memref<8x108xbf16, #tpu.memory_space<vmem>>, vector<8x108xbf16>
    %c0_2 = arith.constant 0 : index
    %c0_3 = arith.constant 0 : index
    %5 = vector.load %arg1[%c0_2, %c0_3] : memref<108x128xbf16, #tpu.memory_space<vmem>>, vector<108x128xbf16>
    %cst_4 = arith.constant dense<0.000000e+00> : vector<8x128xf32>
    %6 = tpu.matmul %4, %5, %cst_4 {dimension_numbers = #tpu.dot_dimension_numbers<[1], [0], [0], [1], [0, 0, 1, 1], [], []>} : vector<8x108xbf16>, vector<108x128xbf16>, vector<8x128xf32> -> vector<8x128xf32>
    %7 = arith.addf %3, %6 : vector<8x128xf32>
    %c0_5 = arith.constant 0 : index
    %c0_6 = arith.constant 0 : index
    %8 = vector.load %arg3[%c0_5, %c0_6] : memref<8x1xf32, #tpu.memory_space<vmem>>, vector<8x1xf32>
    %9 = vector.broadcast %8 : vector<8x1xf32> to vector<8x128xf32>
    %10 = arith.addf %7, %9 : vector<8x128xf32>
    %c0_7 = arith.constant 0 : index
    %c0_8 = arith.constant 0 : index
    %11 = vector.load %arg4[%c0_7, %c0_8] : memref<8x128xf32, #tpu.memory_space<vmem>>, vector<8x128xf32>
    tpu.vector_store %arg4[%c0_7, %c0_8], %10 {strides = array<i32>} : memref<8x128xf32, #tpu.memory_space<vmem>>, vector<8x128xf32>,
    %c0_9 = arith.constant 0 : index
    %c0_10 = arith.constant 0 : index
    %12 = vector.load %arg5[%c0_9, %c0_10] : memref<8x1xf32, #tpu.memory_space<vmem>>, vector<8x1xf32>
    %cst_11 = arith.constant dense<0.000000e+00> : vector<8xf32>
    %13 = vector.multi_reduction <add>, %10, %cst_11 [1] : vector<8x128xf32> to vector<8xf32>
    %14 = vector.shape_cast %13 : vector<8xf32> to vector<8x1xf32>
    %15 = arith.addf %12, %14 : vector<8x1xf32>
    %c0_12 = arith.constant 0 : index
    %c0_13 = arith.constant 0 : index
    %16 = vector.load %arg5[%c0_12, %c0_13] : memref<8x1xf32, #tpu.memory_space<vmem>>, vector<8x1xf32>
    tpu.vector_store %arg5[%c0_12, %c0_13], %15 {strides = array<i32>} : memref<8x1xf32, #tpu.memory_space<vmem>>, vector<8x1xf32>,
    %c0_14 = arith.constant 0 : index
    %c0_15 = arith.constant 0 : index
    %17 = vector.load %arg6[%c0_14, %c0_15] : memref<8x1xf32, #tpu.memory_space<vmem>>, vector<8x1xf32>
    %18 = arith.mulf %10, %10 : vector<8x128xf32>
    %cst_16 = arith.constant dense<0.000000e+00> : vector<8xf32>
    %19 = vector.multi_reduction <add>, %18, %cst_16 [1] : vector<8x128xf32> to vector<8xf32>
    %20 = vector.shape_cast %19 : vector<8xf32> to vector<8x1xf32>
    %21 = arith.addf %17, %20 : vector<8x1xf32>
    %c0_17 = arith.constant 0 : index
    %c0_18 = arith.constant 0 : index
    %22 = vector.load %arg6[%c0_17, %c0_18] : memref<8x1xf32, #tpu.memory_space<vmem>>, vector<8x1xf32>
    tpu.vector_store %arg6[%c0_17, %c0_18], %21 {strides = array<i32>} : memref<8x1xf32, #tpu.memory_space<vmem>>, vector<8x1xf32>,
    return
  }
  func.func @transform_0(%arg0: i32) -> (i32, i32) {
    %c0_i32 = arith.constant 0 : i32
    %c0_i32_0 = arith.constant 0 : i32
    return %c0_i32, %arg0 : i32, i32
  }
  func.func @transform_1(%arg0: i32) -> (i32, i32) {
    %c0_i32 = arith.constant 0 : i32
    %c0_i32_0 = arith.constant 0 : i32
    %c0_i32_1 = arith.constant 0 : i32
    return %c0_i32, %c0_i32_0 : i32, i32
  }
  func.func @transform_2(%arg0: i32) -> (i32, i32) {
    %c0_i32 = arith.constant 0 : i32
    %c0_i32_0 = arith.constant 0 : i32
    %c0_i32_1 = arith.constant 0 : i32
    return %c0_i32, %c0_i32_0 : i32, i32
  }
  func.func @transform_3(%arg0: i32) -> (i32, i32) {
    %c0_i32 = arith.constant 0 : i32
    %c0_i32_0 = arith.constant 0 : i32
    return %c0_i32, %arg0 : i32, i32
  }
  func.func @transform_4(%arg0: i32) -> (i32, i32) {
    %c0_i32 = arith.constant 0 : i32
    %c0_i32_0 = arith.constant 0 : i32
    %c0_i32_1 = arith.constant 0 : i32
    return %c0_i32, %c0_i32_0 : i32, i32
  }
  func.func @transform_5(%arg0: i32) -> (i32, i32) {
    %c0_i32 = arith.constant 0 : i32
    %c0_i32_0 = arith.constant 0 : i32
    %c0_i32_1 = arith.constant 0 : i32
    return %c0_i32, %c0_i32_0 : i32, i32
  }
}

module attributes {stable_mosaic.version = 11 : i64} {
  func.func @_affine_act_kernel(%arg0: i32, %arg1: memref<8x128xf32, #tpu.memory_space<vmem>>, %arg2: memref<8x1xf32, #tpu.memory_space<vmem>>, %arg3: memref<8x1xf32, #tpu.memory_space<vmem>>, %arg4: memref<8x128xf32, #tpu.memory_space<vmem>>) attributes {dimension_semantics = [#tpu.dimension_semantics<parallel>], iteration_bounds = array<i64: 8>, scalar_prefetch = 0 : i64, scratch_operands = 0 : i64, tpu.core_type = #tpu.core_type<tc>, window_params = [{transform_indices = @transform_0, window_bounds = array<i64: 8, 128>}, {pipeline_mode = #tpu.pipeline_mode<synchronous>, transform_indices = @transform_1, window_bounds = array<i64: 8, 1>}, {pipeline_mode = #tpu.pipeline_mode<synchronous>, transform_indices = @transform_2, window_bounds = array<i64: 8, 1>}, {transform_indices = @transform_3, window_bounds = array<i64: 8, 128>}]} {
    %c0 = arith.constant 0 : index
    %c0_0 = arith.constant 0 : index
    %0 = vector.load %arg1[%c0, %c0_0] : memref<8x128xf32, #tpu.memory_space<vmem>>, vector<8x128xf32>
    %c0_1 = arith.constant 0 : index
    %c0_2 = arith.constant 0 : index
    %1 = vector.load %arg2[%c0_1, %c0_2] : memref<8x1xf32, #tpu.memory_space<vmem>>, vector<8x1xf32>
    %2 = vector.broadcast %1 : vector<8x1xf32> to vector<8x128xf32>
    %3 = arith.mulf %0, %2 : vector<8x128xf32>
    %c0_3 = arith.constant 0 : index
    %c0_4 = arith.constant 0 : index
    %4 = vector.load %arg3[%c0_3, %c0_4] : memref<8x1xf32, #tpu.memory_space<vmem>>, vector<8x1xf32>
    %5 = vector.broadcast %4 : vector<8x1xf32> to vector<8x128xf32>
    %6 = arith.addf %3, %5 : vector<8x128xf32>
    %cst = arith.constant 0.000000e+00 : f32
    %7 = vector.broadcast %cst : f32 to vector<8x128xf32>
    %8 = arith.maximumf %6, %7 : vector<8x128xf32>
    %c0_5 = arith.constant 0 : index
    %c0_6 = arith.constant 0 : index
    %9 = vector.load %arg4[%c0_5, %c0_6] : memref<8x128xf32, #tpu.memory_space<vmem>>, vector<8x128xf32>
    tpu.vector_store %arg4[%c0_5, %c0_6], %8 {strides = array<i32>} : memref<8x128xf32, #tpu.memory_space<vmem>>, vector<8x128xf32>,
    return
  }
  func.func @transform_0(%arg0: i32) -> (i32, i32) {
    %c0_i32 = arith.constant 0 : i32
    %c0_i32_0 = arith.constant 0 : i32
    return %c0_i32, %arg0 : i32, i32
  }
  func.func @transform_1(%arg0: i32) -> (i32, i32) {
    %c0_i32 = arith.constant 0 : i32
    %c0_i32_0 = arith.constant 0 : i32
    %c0_i32_1 = arith.constant 0 : i32
    return %c0_i32, %c0_i32_0 : i32, i32
  }
  func.func @transform_2(%arg0: i32) -> (i32, i32) {
    %c0_i32 = arith.constant 0 : i32
    %c0_i32_0 = arith.constant 0 : i32
    %c0_i32_1 = arith.constant 0 : i32
    return %c0_i32, %c0_i32_0 : i32, i32
  }
  func.func @transform_3(%arg0: i32) -> (i32, i32) {
    %c0_i32 = arith.constant 0 : i32
    %c0_i32_0 = arith.constant 0 : i32
    return %c0_i32, %arg0 : i32, i32
  }
}

module attributes {stable_mosaic.version = 11 : i64} {
  func.func @_affine_act_kernel(%arg0: i32, %arg1: memref<8x128xf32, #tpu.memory_space<vmem>>, %arg2: memref<8x1xf32, #tpu.memory_space<vmem>>, %arg3: memref<8x1xf32, #tpu.memory_space<vmem>>, %arg4: memref<8x128xbf16, #tpu.memory_space<vmem>>) attributes {dimension_semantics = [#tpu.dimension_semantics<parallel>], iteration_bounds = array<i64: 8>, scalar_prefetch = 0 : i64, scratch_operands = 0 : i64, tpu.core_type = #tpu.core_type<tc>, window_params = [{transform_indices = @transform_0, window_bounds = array<i64: 8, 128>}, {pipeline_mode = #tpu.pipeline_mode<synchronous>, transform_indices = @transform_1, window_bounds = array<i64: 8, 1>}, {pipeline_mode = #tpu.pipeline_mode<synchronous>, transform_indices = @transform_2, window_bounds = array<i64: 8, 1>}, {transform_indices = @transform_3, window_bounds = array<i64: 8, 128>}]} {
    %c0 = arith.constant 0 : index
    %c0_0 = arith.constant 0 : index
    %0 = vector.load %arg1[%c0, %c0_0] : memref<8x128xf32, #tpu.memory_space<vmem>>, vector<8x128xf32>
    %c0_1 = arith.constant 0 : index
    %c0_2 = arith.constant 0 : index
    %1 = vector.load %arg2[%c0_1, %c0_2] : memref<8x1xf32, #tpu.memory_space<vmem>>, vector<8x1xf32>
    %2 = vector.broadcast %1 : vector<8x1xf32> to vector<8x128xf32>
    %3 = arith.mulf %0, %2 : vector<8x128xf32>
    %c0_3 = arith.constant 0 : index
    %c0_4 = arith.constant 0 : index
    %4 = vector.load %arg3[%c0_3, %c0_4] : memref<8x1xf32, #tpu.memory_space<vmem>>, vector<8x1xf32>
    %5 = vector.broadcast %4 : vector<8x1xf32> to vector<8x128xf32>
    %6 = arith.addf %3, %5 : vector<8x128xf32>
    %cst = arith.constant 0.000000e+00 : f32
    %7 = vector.broadcast %cst : f32 to vector<8x128xf32>
    %8 = arith.maximumf %6, %7 : vector<8x128xf32>
    %9 = arith.truncf %8 : vector<8x128xf32> to vector<8x128xbf16>
    %c0_5 = arith.constant 0 : index
    %c0_6 = arith.constant 0 : index
    %10 = vector.load %arg4[%c0_5, %c0_6] : memref<8x128xbf16, #tpu.memory_space<vmem>>, vector<8x128xbf16>
    tpu.vector_store %arg4[%c0_5, %c0_6], %9 {strides = array<i32>} : memref<8x128xbf16, #tpu.memory_space<vmem>>, vector<8x128xbf16>,
    return
  }
  func.func @transform_0(%arg0: i32) -> (i32, i32) {
    %c0_i32 = arith.constant 0 : i32
    %c0_i32_0 = arith.constant 0 : i32
    return %c0_i32, %arg0 : i32, i32
  }
  func.func @transform_1(%arg0: i32) -> (i32, i32) {
    %c0_i32 = arith.constant 0 : i32
    %c0_i32_0 = arith.constant 0 : i32
    %c0_i32_1 = arith.constant 0 : i32
    return %c0_i32, %c0_i32_0 : i32, i32
  }
  func.func @transform_2(%arg0: i32) -> (i32, i32) {
    %c0_i32 = arith.constant 0 : i32
    %c0_i32_0 = arith.constant 0 : i32
    %c0_i32_1 = arith.constant 0 : i32
    return %c0_i32, %c0_i32_0 : i32, i32
  }
  func.func @transform_3(%arg0: i32) -> (i32, i32) {
    %c0_i32 = arith.constant 0 : i32
    %c0_i32_0 = arith.constant 0 : i32
    return %c0_i32, %arg0 : i32, i32
  }
}

module attributes {stable_mosaic.version = 11 : i64} {
  func.func @_conv_stats_kernel(%arg0: i32, %arg1: memref<216x128xbf16, #tpu.memory_space<vmem>>, %arg2: memref<8x216xbf16, #tpu.memory_space<vmem>>, %arg3: memref<8x1xf32, #tpu.memory_space<vmem>>, %arg4: memref<8x128xf32, #tpu.memory_space<vmem>>, %arg5: memref<8x1xf32, #tpu.memory_space<vmem>>, %arg6: memref<8x1xf32, #tpu.memory_space<vmem>>) attributes {dimension_semantics = [#tpu.dimension_semantics<arbitrary>], iteration_bounds = array<i64: 8>, scalar_prefetch = 0 : i64, scratch_operands = 0 : i64, tpu.core_type = #tpu.core_type<tc>, window_params = [{transform_indices = @transform_0, window_bounds = array<i64: 216, 128>}, {pipeline_mode = #tpu.pipeline_mode<synchronous>, transform_indices = @transform_1, window_bounds = array<i64: 8, 216>}, {pipeline_mode = #tpu.pipeline_mode<synchronous>, transform_indices = @transform_2, window_bounds = array<i64: 8, 1>}, {transform_indices = @transform_3, window_bounds = array<i64: 8, 128>}, {pipeline_mode = #tpu.pipeline_mode<synchronous>, transform_indices = @transform_4, window_bounds = array<i64: 8, 1>}, {pipeline_mode = #tpu.pipeline_mode<synchronous>, transform_indices = @transform_5, window_bounds = array<i64: 8, 1>}]} {
    %c0_i32 = arith.constant 0 : i32
    %0 = arith.cmpi eq, %arg0, %c0_i32 : i32
    %1 = arith.extui %0 : i1 to i32
    %c0_i32_0 = arith.constant 0 : i32
    %2 = arith.cmpi ne, %1, %c0_i32_0 : i32
    scf.if %2 {
      %cst_19 = arith.constant 0.000000e+00 : f32
      %23 = vector.broadcast %cst_19 : f32 to vector<8x1xf32>
      %c0_20 = arith.constant 0 : index
      %c0_21 = arith.constant 0 : index
      %24 = vector.load %arg5[%c0_20, %c0_21] : memref<8x1xf32, #tpu.memory_space<vmem>>, vector<8x1xf32>
      tpu.vector_store %arg5[%c0_20, %c0_21], %23 {strides = array<i32>} : memref<8x1xf32, #tpu.memory_space<vmem>>, vector<8x1xf32>,
      %cst_22 = arith.constant 0.000000e+00 : f32
      %25 = vector.broadcast %cst_22 : f32 to vector<8x1xf32>
      %c0_23 = arith.constant 0 : index
      %c0_24 = arith.constant 0 : index
      %26 = vector.load %arg6[%c0_23, %c0_24] : memref<8x1xf32, #tpu.memory_space<vmem>>, vector<8x1xf32>
      tpu.vector_store %arg6[%c0_23, %c0_24], %25 {strides = array<i32>} : memref<8x1xf32, #tpu.memory_space<vmem>>, vector<8x1xf32>,
    } else {
    }
    %cst = arith.constant 0.000000e+00 : f32
    %3 = vector.broadcast %cst : f32 to vector<8x128xf32>
    %c0 = arith.constant 0 : index
    %c0_1 = arith.constant 0 : index
    %4 = vector.load %arg2[%c0, %c0_1] : memref<8x216xbf16, #tpu.memory_space<vmem>>, vector<8x216xbf16>
    %c0_2 = arith.constant 0 : index
    %c0_3 = arith.constant 0 : index
    %5 = vector.load %arg1[%c0_2, %c0_3] : memref<216x128xbf16, #tpu.memory_space<vmem>>, vector<216x128xbf16>
    %cst_4 = arith.constant dense<0.000000e+00> : vector<8x128xf32>
    %6 = tpu.matmul %4, %5, %cst_4 {dimension_numbers = #tpu.dot_dimension_numbers<[1], [0], [0], [1], [0, 0, 1, 1], [], []>} : vector<8x216xbf16>, vector<216x128xbf16>, vector<8x128xf32> -> vector<8x128xf32>
    %7 = arith.addf %3, %6 : vector<8x128xf32>
    %c0_5 = arith.constant 0 : index
    %c0_6 = arith.constant 0 : index
    %8 = vector.load %arg3[%c0_5, %c0_6] : memref<8x1xf32, #tpu.memory_space<vmem>>, vector<8x1xf32>
    %9 = vector.broadcast %8 : vector<8x1xf32> to vector<8x128xf32>
    %10 = arith.addf %7, %9 : vector<8x128xf32>
    %c0_7 = arith.constant 0 : index
    %c0_8 = arith.constant 0 : index
    %11 = vector.load %arg4[%c0_7, %c0_8] : memref<8x128xf32, #tpu.memory_space<vmem>>, vector<8x128xf32>
    tpu.vector_store %arg4[%c0_7, %c0_8], %10 {strides = array<i32>} : memref<8x128xf32, #tpu.memory_space<vmem>>, vector<8x128xf32>,
    %c0_9 = arith.constant 0 : index
    %c0_10 = arith.constant 0 : index
    %12 = vector.load %arg5[%c0_9, %c0_10] : memref<8x1xf32, #tpu.memory_space<vmem>>, vector<8x1xf32>
    %cst_11 = arith.constant dense<0.000000e+00> : vector<8xf32>
    %13 = vector.multi_reduction <add>, %10, %cst_11 [1] : vector<8x128xf32> to vector<8xf32>
    %14 = vector.shape_cast %13 : vector<8xf32> to vector<8x1xf32>
    %15 = arith.addf %12, %14 : vector<8x1xf32>
    %c0_12 = arith.constant 0 : index
    %c0_13 = arith.constant 0 : index
    %16 = vector.load %arg5[%c0_12, %c0_13] : memref<8x1xf32, #tpu.memory_space<vmem>>, vector<8x1xf32>
    tpu.vector_store %arg5[%c0_12, %c0_13], %15 {strides = array<i32>} : memref<8x1xf32, #tpu.memory_space<vmem>>, vector<8x1xf32>,
    %c0_14 = arith.constant 0 : index
    %c0_15 = arith.constant 0 : index
    %17 = vector.load %arg6[%c0_14, %c0_15] : memref<8x1xf32, #tpu.memory_space<vmem>>, vector<8x1xf32>
    %18 = arith.mulf %10, %10 : vector<8x128xf32>
    %cst_16 = arith.constant dense<0.000000e+00> : vector<8xf32>
    %19 = vector.multi_reduction <add>, %18, %cst_16 [1] : vector<8x128xf32> to vector<8xf32>
    %20 = vector.shape_cast %19 : vector<8xf32> to vector<8x1xf32>
    %21 = arith.addf %17, %20 : vector<8x1xf32>
    %c0_17 = arith.constant 0 : index
    %c0_18 = arith.constant 0 : index
    %22 = vector.load %arg6[%c0_17, %c0_18] : memref<8x1xf32, #tpu.memory_space<vmem>>, vector<8x1xf32>
    tpu.vector_store %arg6[%c0_17, %c0_18], %21 {strides = array<i32>} : memref<8x1xf32, #tpu.memory_space<vmem>>, vector<8x1xf32>,
    return
  }
  func.func @transform_0(%arg0: i32) -> (i32, i32) {
    %c0_i32 = arith.constant 0 : i32
    %c0_i32_0 = arith.constant 0 : i32
    return %c0_i32, %arg0 : i32, i32
  }
  func.func @transform_1(%arg0: i32) -> (i32, i32) {
    %c0_i32 = arith.constant 0 : i32
    %c0_i32_0 = arith.constant 0 : i32
    %c0_i32_1 = arith.constant 0 : i32
    return %c0_i32, %c0_i32_0 : i32, i32
  }
  func.func @transform_2(%arg0: i32) -> (i32, i32) {
    %c0_i32 = arith.constant 0 : i32
    %c0_i32_0 = arith.constant 0 : i32
    %c0_i32_1 = arith.constant 0 : i32
    return %c0_i32, %c0_i32_0 : i32, i32
  }
  func.func @transform_3(%arg0: i32) -> (i32, i32) {
    %c0_i32 = arith.constant 0 : i32
    %c0_i32_0 = arith.constant 0 : i32
    return %c0_i32, %arg0 : i32, i32
  }
  func.func @transform_4(%arg0: i32) -> (i32, i32) {
    %c0_i32 = arith.constant 0 : i32
    %c0_i32_0 = arith.constant 0 : i32
    %c0_i32_1 = arith.constant 0 : i32
    return %c0_i32, %c0_i32_0 : i32, i32
  }
  func.func @transform_5(%arg0: i32) -> (i32, i32) {
    %c0_i32 = arith.constant 0 : i32
    %c0_i32_0 = arith.constant 0 : i32
    %c0_i32_1 = arith.constant 0 : i32
    return %c0_i32, %c0_i32_0 : i32, i32
  }
}

module attributes {stable_mosaic.version = 11 : i64} {
  func.func @_affine_act_kernel(%arg0: i32, %arg1: memref<8x128xf32, #tpu.memory_space<vmem>>, %arg2: memref<8x1xf32, #tpu.memory_space<vmem>>, %arg3: memref<8x1xf32, #tpu.memory_space<vmem>>, %arg4: memref<8x128xf32, #tpu.memory_space<vmem>>) attributes {dimension_semantics = [#tpu.dimension_semantics<parallel>], iteration_bounds = array<i64: 8>, scalar_prefetch = 0 : i64, scratch_operands = 0 : i64, tpu.core_type = #tpu.core_type<tc>, window_params = [{transform_indices = @transform_0, window_bounds = array<i64: 8, 128>}, {pipeline_mode = #tpu.pipeline_mode<synchronous>, transform_indices = @transform_1, window_bounds = array<i64: 8, 1>}, {pipeline_mode = #tpu.pipeline_mode<synchronous>, transform_indices = @transform_2, window_bounds = array<i64: 8, 1>}, {transform_indices = @transform_3, window_bounds = array<i64: 8, 128>}]} {
    %c0 = arith.constant 0 : index
    %c0_0 = arith.constant 0 : index
    %0 = vector.load %arg1[%c0, %c0_0] : memref<8x128xf32, #tpu.memory_space<vmem>>, vector<8x128xf32>
    %c0_1 = arith.constant 0 : index
    %c0_2 = arith.constant 0 : index
    %1 = vector.load %arg2[%c0_1, %c0_2] : memref<8x1xf32, #tpu.memory_space<vmem>>, vector<8x1xf32>
    %2 = vector.broadcast %1 : vector<8x1xf32> to vector<8x128xf32>
    %3 = arith.mulf %0, %2 : vector<8x128xf32>
    %c0_3 = arith.constant 0 : index
    %c0_4 = arith.constant 0 : index
    %4 = vector.load %arg3[%c0_3, %c0_4] : memref<8x1xf32, #tpu.memory_space<vmem>>, vector<8x1xf32>
    %5 = vector.broadcast %4 : vector<8x1xf32> to vector<8x128xf32>
    %6 = arith.addf %3, %5 : vector<8x128xf32>
    %cst = arith.constant 0.000000e+00 : f32
    %7 = vector.broadcast %cst : f32 to vector<8x128xf32>
    %8 = arith.maximumf %6, %7 : vector<8x128xf32>
    %9 = math.absf %6 : vector<8x128xf32>
    %cst_5 = arith.constant 0.000000e+00 : f32
    %10 = vector.broadcast %cst_5 : f32 to vector<8x128xf32>
    %11 = arith.subf %10, %9 : vector<8x128xf32>
    %12 = math.exp %11 : vector<8x128xf32>
    %cst_6 = arith.constant 1.000000e+00 : f32
    %13 = vector.broadcast %cst_6 : f32 to vector<8x128xf32>
    %14 = arith.addf %13, %12 : vector<8x128xf32>
    %15 = math.log %14 : vector<8x128xf32>
    %16 = arith.addf %8, %15 : vector<8x128xf32>
    %17 = math.tanh %16 : vector<8x128xf32>
    %18 = arith.mulf %6, %17 : vector<8x128xf32>
    %c0_7 = arith.constant 0 : index
    %c0_8 = arith.constant 0 : index
    %19 = vector.load %arg4[%c0_7, %c0_8] : memref<8x128xf32, #tpu.memory_space<vmem>>, vector<8x128xf32>
    tpu.vector_store %arg4[%c0_7, %c0_8], %18 {strides = array<i32>} : memref<8x128xf32, #tpu.memory_space<vmem>>, vector<8x128xf32>,
    return
  }
  func.func @transform_0(%arg0: i32) -> (i32, i32) {
    %c0_i32 = arith.constant 0 : i32
    %c0_i32_0 = arith.constant 0 : i32
    return %c0_i32, %arg0 : i32, i32
  }
  func.func @transform_1(%arg0: i32) -> (i32, i32) {
    %c0_i32 = arith.constant 0 : i32
    %c0_i32_0 = arith.constant 0 : i32
    %c0_i32_1 = arith.constant 0 : i32
    return %c0_i32, %c0_i32_0 : i32, i32
  }
  func.func @transform_2(%arg0: i32) -> (i32, i32) {
    %c0_i32 = arith.constant 0 : i32
    %c0_i32_0 = arith.constant 0 : i32
    %c0_i32_1 = arith.constant 0 : i32
    return %c0_i32, %c0_i32_0 : i32, i32
  }
  func.func @transform_3(%arg0: i32) -> (i32, i32) {
    %c0_i32 = arith.constant 0 : i32
    %c0_i32_0 = arith.constant 0 : i32
    return %c0_i32, %arg0 : i32, i32
  }
}

module attributes {stable_mosaic.version = 11 : i64} {
  func.func @_affine_act_kernel(%arg0: i32, %arg1: memref<8x128xf32, #tpu.memory_space<vmem>>, %arg2: memref<8x1xf32, #tpu.memory_space<vmem>>, %arg3: memref<8x1xf32, #tpu.memory_space<vmem>>, %arg4: memref<8x128xbf16, #tpu.memory_space<vmem>>) attributes {dimension_semantics = [#tpu.dimension_semantics<parallel>], iteration_bounds = array<i64: 8>, scalar_prefetch = 0 : i64, scratch_operands = 0 : i64, tpu.core_type = #tpu.core_type<tc>, window_params = [{transform_indices = @transform_0, window_bounds = array<i64: 8, 128>}, {pipeline_mode = #tpu.pipeline_mode<synchronous>, transform_indices = @transform_1, window_bounds = array<i64: 8, 1>}, {pipeline_mode = #tpu.pipeline_mode<synchronous>, transform_indices = @transform_2, window_bounds = array<i64: 8, 1>}, {transform_indices = @transform_3, window_bounds = array<i64: 8, 128>}]} {
    %c0 = arith.constant 0 : index
    %c0_0 = arith.constant 0 : index
    %0 = vector.load %arg1[%c0, %c0_0] : memref<8x128xf32, #tpu.memory_space<vmem>>, vector<8x128xf32>
    %c0_1 = arith.constant 0 : index
    %c0_2 = arith.constant 0 : index
    %1 = vector.load %arg2[%c0_1, %c0_2] : memref<8x1xf32, #tpu.memory_space<vmem>>, vector<8x1xf32>
    %2 = vector.broadcast %1 : vector<8x1xf32> to vector<8x128xf32>
    %3 = arith.mulf %0, %2 : vector<8x128xf32>
    %c0_3 = arith.constant 0 : index
    %c0_4 = arith.constant 0 : index
    %4 = vector.load %arg3[%c0_3, %c0_4] : memref<8x1xf32, #tpu.memory_space<vmem>>, vector<8x1xf32>
    %5 = vector.broadcast %4 : vector<8x1xf32> to vector<8x128xf32>
    %6 = arith.addf %3, %5 : vector<8x128xf32>
    %cst = arith.constant 0.000000e+00 : f32
    %7 = vector.broadcast %cst : f32 to vector<8x128xf32>
    %8 = arith.maximumf %6, %7 : vector<8x128xf32>
    %9 = math.absf %6 : vector<8x128xf32>
    %cst_5 = arith.constant 0.000000e+00 : f32
    %10 = vector.broadcast %cst_5 : f32 to vector<8x128xf32>
    %11 = arith.subf %10, %9 : vector<8x128xf32>
    %12 = math.exp %11 : vector<8x128xf32>
    %cst_6 = arith.constant 1.000000e+00 : f32
    %13 = vector.broadcast %cst_6 : f32 to vector<8x128xf32>
    %14 = arith.addf %13, %12 : vector<8x128xf32>
    %15 = math.log %14 : vector<8x128xf32>
    %16 = arith.addf %8, %15 : vector<8x128xf32>
    %17 = math.tanh %16 : vector<8x128xf32>
    %18 = arith.mulf %6, %17 : vector<8x128xf32>
    %19 = arith.truncf %18 : vector<8x128xf32> to vector<8x128xbf16>
    %c0_7 = arith.constant 0 : index
    %c0_8 = arith.constant 0 : index
    %20 = vector.load %arg4[%c0_7, %c0_8] : memref<8x128xbf16, #tpu.memory_space<vmem>>, vector<8x128xbf16>
    tpu.vector_store %arg4[%c0_7, %c0_8], %19 {strides = array<i32>} : memref<8x128xbf16, #tpu.memory_space<vmem>>, vector<8x128xbf16>,
    return
  }
  func.func @transform_0(%arg0: i32) -> (i32, i32) {
    %c0_i32 = arith.constant 0 : i32
    %c0_i32_0 = arith.constant 0 : i32
    return %c0_i32, %arg0 : i32, i32
  }
  func.func @transform_1(%arg0: i32) -> (i32, i32) {
    %c0_i32 = arith.constant 0 : i32
    %c0_i32_0 = arith.constant 0 : i32
    %c0_i32_1 = arith.constant 0 : i32
    return %c0_i32, %c0_i32_0 : i32, i32
  }
  func.func @transform_2(%arg0: i32) -> (i32, i32) {
    %c0_i32 = arith.constant 0 : i32
    %c0_i32_0 = arith.constant 0 : i32
    %c0_i32_1 = arith.constant 0 : i32
    return %c0_i32, %c0_i32_0 : i32, i32
  }
  func.func @transform_3(%arg0: i32) -> (i32, i32) {
    %c0_i32 = arith.constant 0 : i32
    %c0_i32_0 = arith.constant 0 : i32
    return %c0_i32, %arg0 : i32, i32
  }
}

module attributes {stable_mosaic.version = 11 : i64} {
  func.func @_conv_stats_kernel(%arg0: i32, %arg1: memref<8x128xbf16, #tpu.memory_space<vmem>>, %arg2: memref<8x128xbf16, #tpu.memory_space<vmem>>, %arg3: memref<8x128xbf16, #tpu.memory_space<vmem>>, %arg4: memref<8x8xbf16, #tpu.memory_space<vmem>>, %arg5: memref<8x8xbf16, #tpu.memory_space<vmem>>, %arg6: memref<8x8xbf16, #tpu.memory_space<vmem>>, %arg7: memref<8x1xf32, #tpu.memory_space<vmem>>, %arg8: memref<8x128xf32, #tpu.memory_space<vmem>>, %arg9: memref<8x1xf32, #tpu.memory_space<vmem>>, %arg10: memref<8x1xf32, #tpu.memory_space<vmem>>) attributes {dimension_semantics = [#tpu.dimension_semantics<arbitrary>], iteration_bounds = array<i64: 8>, scalar_prefetch = 0 : i64, scratch_operands = 0 : i64, tpu.core_type = #tpu.core_type<tc>, window_params = [{transform_indices = @transform_0, window_bounds = array<i64: 8, 128>}, {transform_indices = @transform_1, window_bounds = array<i64: 8, 128>}, {transform_indices = @transform_2, window_bounds = array<i64: 8, 128>}, {pipeline_mode = #tpu.pipeline_mode<synchronous>, transform_indices = @transform_3, window_bounds = array<i64: 8, 8>}, {pipeline_mode = #tpu.pipeline_mode<synchronous>, transform_indices = @transform_4, window_bounds = array<i64: 8, 8>}, {pipeline_mode = #tpu.pipeline_mode<synchronous>, transform_indices = @transform_5, window_bounds = array<i64: 8, 8>}, {pipeline_mode = #tpu.pipeline_mode<synchronous>, transform_indices = @transform_6, window_bounds = array<i64: 8, 1>}, {transform_indices = @transform_7, window_bounds = array<i64: 8, 128>}, {pipeline_mode = #tpu.pipeline_mode<synchronous>, transform_indices = @transform_8, window_bounds = array<i64: 8, 1>}, {pipeline_mode = #tpu.pipeline_mode<synchronous>, transform_indices = @transform_9, window_bounds = array<i64: 8, 1>}]} {
    %c0_i32 = arith.constant 0 : i32
    %0 = arith.cmpi eq, %arg0, %c0_i32 : i32
    %1 = arith.extui %0 : i1 to i32
    %c0_i32_0 = arith.constant 0 : i32
    %2 = arith.cmpi ne, %1, %c0_i32_0 : i32
    scf.if %2 {
      %cst_29 = arith.constant 0.000000e+00 : f32
      %31 = vector.broadcast %cst_29 : f32 to vector<8x1xf32>
      %c0_30 = arith.constant 0 : index
      %c0_31 = arith.constant 0 : index
      %32 = vector.load %arg9[%c0_30, %c0_31] : memref<8x1xf32, #tpu.memory_space<vmem>>, vector<8x1xf32>
      tpu.vector_store %arg9[%c0_30, %c0_31], %31 {strides = array<i32>} : memref<8x1xf32, #tpu.memory_space<vmem>>, vector<8x1xf32>,
      %cst_32 = arith.constant 0.000000e+00 : f32
      %33 = vector.broadcast %cst_32 : f32 to vector<8x1xf32>
      %c0_33 = arith.constant 0 : index
      %c0_34 = arith.constant 0 : index
      %34 = vector.load %arg10[%c0_33, %c0_34] : memref<8x1xf32, #tpu.memory_space<vmem>>, vector<8x1xf32>
      tpu.vector_store %arg10[%c0_33, %c0_34], %33 {strides = array<i32>} : memref<8x1xf32, #tpu.memory_space<vmem>>, vector<8x1xf32>,
    } else {
    }
    %cst = arith.constant 0.000000e+00 : f32
    %3 = vector.broadcast %cst : f32 to vector<8x128xf32>
    %c0 = arith.constant 0 : index
    %c0_1 = arith.constant 0 : index
    %4 = vector.load %arg4[%c0, %c0_1] : memref<8x8xbf16, #tpu.memory_space<vmem>>, vector<8x8xbf16>
    %c0_2 = arith.constant 0 : index
    %c0_3 = arith.constant 0 : index
    %5 = vector.load %arg1[%c0_2, %c0_3] : memref<8x128xbf16, #tpu.memory_space<vmem>>, vector<8x128xbf16>
    %cst_4 = arith.constant dense<0.000000e+00> : vector<8x128xf32>
    %6 = tpu.matmul %4, %5, %cst_4 {dimension_numbers = #tpu.dot_dimension_numbers<[1], [0], [0], [1], [0, 0, 1, 1], [], []>} : vector<8x8xbf16>, vector<8x128xbf16>, vector<8x128xf32> -> vector<8x128xf32>
    %7 = arith.addf %3, %6 : vector<8x128xf32>
    %c0_5 = arith.constant 0 : index
    %c0_6 = arith.constant 0 : index
    %8 = vector.load %arg5[%c0_5, %c0_6] : memref<8x8xbf16, #tpu.memory_space<vmem>>, vector<8x8xbf16>
    %c0_7 = arith.constant 0 : index
    %c0_8 = arith.constant 0 : index
    %9 = vector.load %arg2[%c0_7, %c0_8] : memref<8x128xbf16, #tpu.memory_space<vmem>>, vector<8x128xbf16>
    %cst_9 = arith.constant dense<0.000000e+00> : vector<8x128xf32>
    %10 = tpu.matmul %8, %9, %cst_9 {dimension_numbers = #tpu.dot_dimension_numbers<[1], [0], [0], [1], [0, 0, 1, 1], [], []>} : vector<8x8xbf16>, vector<8x128xbf16>, vector<8x128xf32> -> vector<8x128xf32>
    %11 = arith.addf %7, %10 : vector<8x128xf32>
    %c0_10 = arith.constant 0 : index
    %c0_11 = arith.constant 0 : index
    %12 = vector.load %arg6[%c0_10, %c0_11] : memref<8x8xbf16, #tpu.memory_space<vmem>>, vector<8x8xbf16>
    %c0_12 = arith.constant 0 : index
    %c0_13 = arith.constant 0 : index
    %13 = vector.load %arg3[%c0_12, %c0_13] : memref<8x128xbf16, #tpu.memory_space<vmem>>, vector<8x128xbf16>
    %cst_14 = arith.constant dense<0.000000e+00> : vector<8x128xf32>
    %14 = tpu.matmul %12, %13, %cst_14 {dimension_numbers = #tpu.dot_dimension_numbers<[1], [0], [0], [1], [0, 0, 1, 1], [], []>} : vector<8x8xbf16>, vector<8x128xbf16>, vector<8x128xf32> -> vector<8x128xf32>
    %15 = arith.addf %11, %14 : vector<8x128xf32>
    %c0_15 = arith.constant 0 : index
    %c0_16 = arith.constant 0 : index
    %16 = vector.load %arg7[%c0_15, %c0_16] : memref<8x1xf32, #tpu.memory_space<vmem>>, vector<8x1xf32>
    %17 = vector.broadcast %16 : vector<8x1xf32> to vector<8x128xf32>
    %18 = arith.addf %15, %17 : vector<8x128xf32>
    %c0_17 = arith.constant 0 : index
    %c0_18 = arith.constant 0 : index
    %19 = vector.load %arg8[%c0_17, %c0_18] : memref<8x128xf32, #tpu.memory_space<vmem>>, vector<8x128xf32>
    tpu.vector_store %arg8[%c0_17, %c0_18], %18 {strides = array<i32>} : memref<8x128xf32, #tpu.memory_space<vmem>>, vector<8x128xf32>,
    %c0_19 = arith.constant 0 : index
    %c0_20 = arith.constant 0 : index
    %20 = vector.load %arg9[%c0_19, %c0_20] : memref<8x1xf32, #tpu.memory_space<vmem>>, vector<8x1xf32>
    %cst_21 = arith.constant dense<0.000000e+00> : vector<8xf32>
    %21 = vector.multi_reduction <add>, %18, %cst_21 [1] : vector<8x128xf32> to vector<8xf32>
    %22 = vector.shape_cast %21 : vector<8xf32> to vector<8x1xf32>
    %23 = arith.addf %20, %22 : vector<8x1xf32>
    %c0_22 = arith.constant 0 : index
    %c0_23 = arith.constant 0 : index
    %24 = vector.load %arg9[%c0_22, %c0_23] : memref<8x1xf32, #tpu.memory_space<vmem>>, vector<8x1xf32>
    tpu.vector_store %arg9[%c0_22, %c0_23], %23 {strides = array<i32>} : memref<8x1xf32, #tpu.memory_space<vmem>>, vector<8x1xf32>,
    %c0_24 = arith.constant 0 : index
    %c0_25 = arith.constant 0 : index
    %25 = vector.load %arg10[%c0_24, %c0_25] : memref<8x1xf32, #tpu.memory_space<vmem>>, vector<8x1xf32>
    %26 = arith.mulf %18, %18 : vector<8x128xf32>
    %cst_26 = arith.constant dense<0.000000e+00> : vector<8xf32>
    %27 = vector.multi_reduction <add>, %26, %cst_26 [1] : vector<8x128xf32> to vector<8xf32>
    %28 = vector.shape_cast %27 : vector<8xf32> to vector<8x1xf32>
    %29 = arith.addf %25, %28 : vector<8x1xf32>
    %c0_27 = arith.constant 0 : index
    %c0_28 = arith.constant 0 : index
    %30 = vector.load %arg10[%c0_27, %c0_28] : memref<8x1xf32, #tpu.memory_space<vmem>>, vector<8x1xf32>
    tpu.vector_store %arg10[%c0_27, %c0_28], %29 {strides = array<i32>} : memref<8x1xf32, #tpu.memory_space<vmem>>, vector<8x1xf32>,
    return
  }
  func.func @transform_0(%arg0: i32) -> (i32, i32) {
    %c0_i32 = arith.constant 0 : i32
    %c0_i32_0 = arith.constant 0 : i32
    return %c0_i32, %arg0 : i32, i32
  }
  func.func @transform_1(%arg0: i32) -> (i32, i32) {
    %c0_i32 = arith.constant 0 : i32
    %c0_i32_0 = arith.constant 0 : i32
    return %c0_i32, %arg0 : i32, i32
  }
  func.func @transform_2(%arg0: i32) -> (i32, i32) {
    %c0_i32 = arith.constant 0 : i32
    %c0_i32_0 = arith.constant 0 : i32
    return %c0_i32, %arg0 : i32, i32
  }
  func.func @transform_3(%arg0: i32) -> (i32, i32) {
    %c0_i32 = arith.constant 0 : i32
    %c0_i32_0 = arith.constant 0 : i32
    %c0_i32_1 = arith.constant 0 : i32
    return %c0_i32, %c0_i32_0 : i32, i32
  }
  func.func @transform_4(%arg0: i32) -> (i32, i32) {
    %c0_i32 = arith.constant 0 : i32
    %c0_i32_0 = arith.constant 0 : i32
    %c0_i32_1 = arith.constant 0 : i32
    return %c0_i32, %c0_i32_0 : i32, i32
  }
  func.func @transform_5(%arg0: i32) -> (i32, i32) {
    %c0_i32 = arith.constant 0 : i32
    %c0_i32_0 = arith.constant 0 : i32
    %c0_i32_1 = arith.constant 0 : i32
    return %c0_i32, %c0_i32_0 : i32, i32
  }
  func.func @transform_6(%arg0: i32) -> (i32, i32) {
    %c0_i32 = arith.constant 0 : i32
    %c0_i32_0 = arith.constant 0 : i32
    %c0_i32_1 = arith.constant 0 : i32
    return %c0_i32, %c0_i32_0 : i32, i32
  }
  func.func @transform_7(%arg0: i32) -> (i32, i32) {
    %c0_i32 = arith.constant 0 : i32
    %c0_i32_0 = arith.constant 0 : i32
    return %c0_i32, %arg0 : i32, i32
  }
  func.func @transform_8(%arg0: i32) -> (i32, i32) {
    %c0_i32 = arith.constant 0 : i32
    %c0_i32_0 = arith.constant 0 : i32
    %c0_i32_1 = arith.constant 0 : i32
    return %c0_i32, %c0_i32_0 : i32, i32
  }
  func.func @transform_9(%arg0: i32) -> (i32, i32) {
    %c0_i32 = arith.constant 0 : i32
    %c0_i32_0 = arith.constant 0 : i32
    %c0_i32_1 = arith.constant 0 : i32
    return %c0_i32, %c0_i32_0 : i32, i32
  }
}

</mosaic_0001>

<bundles_post_ra>
// kernel: dual_dilated_block_forward.22
= control target key start
LH: loop header
LB: loop body
LE: loop exit
PB: predicated region body
PF: predicated region fallthrough
CT: control target
= control target key end

     0   :  { %s619_s18 = smov 0   ;;  %s621_s19 = smov 0   ;;  %s701_s0 = inlined_call_operand.vmem [shape: bf16[108,1024], index: 0, kind: input, shape index: {}]   ;;  %s702_s1 = inlined_call_operand.vmem [shape: bf16[8,108], index: 1, kind: input, shape index: {}]   ;;  %s703_s2 = inlined_call_operand.vmem [shape: f32[8,1], index: 2, kind: input, shape index: {}]   ;;  %s704_s3 = inlined_call_operand.vmem [shape: f32[8,1024], index: 3, kind: output, shape index: {0}]   ;;  %s705_s4 = inlined_call_operand.vmem [shape: f32[8,1], index: 4, kind: output, shape index: {1}]   ;;  %s706_s5 = inlined_call_operand.vmem [shape: f32[8,1], index: 5, kind: output, shape index: {2}]  }
   0x1   :  { %s623_s20 = smov 0  }
   0x2 LB: > { %s635_s21 = sadd.s32 4294967295, %s585_s20   ;;  %s638_s22 = sadd.s32 1, %s585_s20   ;;  %s585_s20 = sphi %s623_s20, %s709_s20   ;;  %s581_s19 = sphi %s621_s19, %s708_s19   ;;  %s577_s18 = sphi %s619_s18, %s707_s18  }
   0x3   : > { %s20_s23 = ssub.s32 %s585_s20, %s638_s22  ;;  %s23_s24 = sadd.s32 1, %s581_s19 }
   0x4   : > { %p21_p0 = scmp.eq.s32.totalorder %s20_s23, 0  ;;  %p30_p1 = scmp.ne.s32.totalorder %s581_s19, %s577_s18 }
   0x5   : > { %p31_p2 = scmp.eq.s32.totalorder %s585_s20, 0  ;;  %p491_p4 = scmp.ge.s32.totalorder %s585_s20, 8 }
   0x6   : > { %s647_s25 = scalar_select %p21_p0, %s581_s19, %s23_s24  }
   0x7   : > { %p32_p3 = por %p31_p2, %p30_p1  ;;  %172 = sbr.rel (%p491_p4) target bundleno = 30 (0x1e), region = 24 }
   0xc   : > { %175 = sbr.rel (!%p32_p3) target bundleno = 30 (0x1e), region = 28  ;;  %s177_s26 = sand.u32 (%p32_p3), 1, %s581_s19  }
   0xd   : > { %s492_s27 = sshll.u32 (%p32_p3), %s585_s20, 2  ;;  %s534_s28 = smul.u32 (%p32_p3), 56, %s177_s26 }
   0xe   : > { %s181_s6 = scalar_lea.vmem (%p32_p3), %s701_s0, %s492_s27 }
   0xf   : > { %v198_v0 = vld [vmem:[%s181_s6] sm:$0xf] (%p32_p3)  ;;  %s179_s7 = scalar_lea.vmem (%p32_p3), [#allocation2], %s534_s28 }
  0x10   : > { %v200_v1 = vld [vmem:[%s181_s6 + $0x20] sm:$0xf] (%p32_p3)  ;;  %199 = vst [vmem:[%s179_s7] sm:$0xf] (%p32_p3), %v198_v0 }
  0x11   : > { %v202_v2 = vld [vmem:[%s181_s6 + $0x40] sm:$0xf]  ;;  %201 = vst [vmem:[%s179_s7 + $0x4] sm:$0xf] %v200_v1 }
  0x12   : > { %v204_v3 = vld [vmem:[%s181_s6 + $0x60] sm:$0xf]  ;;  %203 = vst [vmem:[%s179_s7 + $0x8] sm:$0xf] %v202_v2 }
  0x13   : > { %v206_v4 = vld [vmem:[%s181_s6 + $0x80] sm:$0xf]  ;;  %205 = vst [vmem:[%s179_s7 + $0xc] sm:$0xf] %v204_v3 }
  0x14   : > { %v208_v5 = vld [vmem:[%s181_s6 + $0xa0] sm:$0xf]  ;;  %207 = vst [vmem:[%s179_s7 + $0x10] sm:$0xf] %v206_v4 }
  0x15   : > { %v210_v6 = vld [vmem:[%s181_s6 + $0xc0] sm:$0xf]  ;;  %209 = vst [vmem:[%s179_s7 + $0x14] sm:$0xf] %v208_v5 }
  0x16   : > { %v212_v7 = vld [vmem:[%s181_s6 + $0xe0] sm:$0xf]  ;;  %211 = vst [vmem:[%s179_s7 + $0x18] sm:$0xf] %v210_v6 }
  0x17   : > { %v214_v8 = vld [vmem:[%s181_s6 + $0x100] sm:$0xf]  ;;  %213 = vst [vmem:[%s179_s7 + $0x1c] sm:$0xf] %v212_v7 }
  0x18   : > { %v216_v9 = vld [vmem:[%s181_s6 + $0x120] sm:$0xf]  ;;  %215 = vst [vmem:[%s179_s7 + $0x20] sm:$0xf] %v214_v8 }
  0x19   : > { %v218_v10 = vld [vmem:[%s181_s6 + $0x140] sm:$0xf]  ;;  %217 = vst [vmem:[%s179_s7 + $0x24] sm:$0xf] %v216_v9 }
  0x1a   : > { %v220_v11 = vld [vmem:[%s181_s6 + $0x160] sm:$0xf]  ;;  %219 = vst [vmem:[%s179_s7 + $0x28] sm:$0xf] %v218_v10 }
  0x1b   : > { %v222_v12 = vld [vmem:[%s181_s6 + $0x180] sm:$0xf]  ;;  %221 = vst [vmem:[%s179_s7 + $0x2c] sm:$0xf] %v220_v11 }
  0x1c   : > { %v224_v13 = vld [vmem:[%s181_s6 + $0x1a0] sm:$0xf]  ;;  %223 = vst [vmem:[%s179_s7 + $0x30] sm:$0xf] %v222_v12 }
  0x1d   : > { %225 = vst [vmem:[%s179_s7 + $0x34] sm:$0xf] %v224_v13 }
  0x1e PF: > { %p493_p5 = scmp.ge.s32.totalorder %s585_s20, 1  ;;  %p276_p6 = scmp.lt.s32.totalorder %s585_s20, 9 }
  0x20   : > { %p277_p7 = pnand %p493_p5, %p276_p6 }
  0x21   : > { %s283_s8 = sand.u32 (!%p277_p7), 1, %s577_s18   ;;  %p309_p8 = scmp.lt.s32.totalorder (!%p277_p7), %s635_s21, 7 }
  0x22   : > { %280 = sbr.rel (%p277_p7) target bundleno = 328 (0x148), region = 69  ;;  %p495_p9 = scmp.ne.s32.totalorder (!%p277_p7), %s635_s21, 0 }
  0x23   : > { %s535_s9 = smul.u32 (!%p277_p7), 56, %s283_s8 }
  0x25   : > { %s285_s15 = scalar_lea.vmem (!%p277_p7), [#allocation2], %s535_s9 }
  0x27   : > { %s310_s10 = scalar_select %p309_p8, %s635_s21, 7 }
  0x28   : > { %317 = sbr.rel (%p495_p9) target bundleno = 48 (0x30), region = 77 }
  0x29   : > { %s494_s11 = sshll.u32 %s310_s10, 3 }
  0x2a   : > { %s663_s14 = scalar_lea.vmem %s704_s3, %s494_s11 }
  0x2d   : > { %vm318_vm0 = vcmask 7168   ;;  %v587_v14 = vmov 0.0  }
  0x2e   : > { %319 = vst.msk [vmem:[%s705_s4] sm:$0xff] %vm318_vm0, %v587_v14 }
  0x2f   : > { %320 = vst.msk [vmem:[%s706_s5] sm:$0xff] %vm318_vm0, %v587_v14 }
  0x30 PF: > { %v522_v15 = vld [vmem:[%s285_s15 + $0x30] sm:$0xf]  ;;  %v533_v16 = vld [vmem:[%s285_s15 + $0x30] sm:$0x30]  ;;  %vm387_vm1 = vcmask 1045504   ;;  %v588_v18 = vmov 0  }
  0x31   : > { %v523_v17 = vor.u32 %v533_v16, %v522_v15  ;;  %562 = vset.pattern.permute.xlu0 %v588_v18  ;;  %v336_v20 = vld [vmem:[%s703_s2] sm:$0xff]  ;;  %v530_v23 = vld [vmem:[%s285_s15 + $0x18] sm:$0xff]  ;;  %v529_v24 = vld [vmem:[%s285_s15 + $0x10] sm:$0xff]  ;;  %vm383_vm2 = vcmask 883712   ;;  %vm409_vm3 = vcmask 7168  }
  0x32   : > { %v532_v21 = vld [vmem:[%s285_s15 + $0x28] sm:$0xff]  ;;  %339 = vperm.xlu0 %562, %v336_v20   ;;  %v531_v22 = vld [vmem:[%s285_s15 + $0x20] sm:$0xff] }
  0x33   : > { %v389_v19 = vsel %vm387_vm1, %v523_v17, 0  ;;  %v528_v25 = vld [vmem:[%s285_s15 + $0x8] sm:$0xff]  ;;  %v527_v26 = vld [vmem:[%s285_s15] sm:$0xff] }
  0x34   : > { %392 = vmatpush.bf16.msra.mxu0 %v389_v19  ;;  %v321_v27 = vld [vmem:[%s702_s1] sm:$0xf] }
  0x35   : > { %v405_v33 = vld [vmem:[%s705_s4] sm:$0xff] }
  0x36   : > { %v411_v35 = vld [vmem:[%s706_s5] sm:$0xff] }
  0x38   : > { %393 = vmatpush.bf16.msra.mxu0 %v532_v21 }
  0x3c   : > { %394 = vmatpush.bf16.msra.mxu0 %v531_v22 }
  0x40   : > { %395 = vmatpush.bf16.msra.mxu0 %v530_v23 }
  0x44   : > { %396 = vmatpush.bf16.msra.mxu0 %v529_v24 }
  0x48   : > { %397 = vmatpush.bf16.msra.mxu0 %v528_v25 }
  0x4c   : > { %398 = vmatpush.bf16.msra.mxu0 %v527_v26 }
  0x4f   : > { %524 = vmatmul.msk.bf16.vlgmr.msra.gmra.mxu0 %vm383_vm2, %v321_v27 }
  0xa4   : > { %v340_v28 = vpop.permute.xlu0 %339 }
  0xcc   : > { %v400_v29 = vpop.f32.mrf.mxu0 }
  0xcd   : > { %v401_v30 = vadd.f32 %v400_v29, %v340_v28 }
  0xcf   : > { %404 = vst [vmem:[%s663_s14] sm:$0xff] %v401_v30  ;;  %406 = vadd.xlane.f32.xlu0 %v401_v30  ;;  %v412_v31 = vmul.f32 %v401_v30, %v401_v30 }
  0xd1   : > { %413 = vadd.xlane.f32.xlu1 %v412_v31 }
  0xd4   : > { %v402_v32 = vpop.f32.mrf.mxu0 }
 0x142   : > { %v407_v34 = vpop.xlane.xlu0 %406 }
 0x143   : > { %v408_v36 = vadd.f32 %v407_v34, %v405_v33 }
 0x144   : > { %v414_v37 = vpop.xlane.xlu1 %413 }
 0x145   : > { %410 = vst.msk [vmem:[%s705_s4] sm:$0xff] %vm409_vm3, %v408_v36  ;;  %v415_v38 = vadd.f32 %v414_v37, %v411_v35 }
 0x147   : > { %416 = vst.msk [vmem:[%s706_s5] sm:$0xff] %vm409_vm3, %v415_v38 }
 0x148 PF: > { %p13_p10 = scmp.ge.s32.totalorder %s638_s22, 10   ;;  %s707_s18 = smov %s581_s19 }
 0x149   : > { %s708_s19 = smov %s647_s25  ;;  %s709_s20 = smov %s638_s22 }
 0x14a   :  { %15 = sbr.rel (!%p13_p10) target bundleno = 2 (0x2), region = 128 }

// kernel: dual_dilated_block_forward.23
= control target key start
LH: loop header
LB: loop body
LE: loop exit
PB: predicated region body
PF: predicated region fallthrough
CT: control target
= control target key end

     0   :  { %s284_s12 = smov 0   ;;  %s301_s0 = inlined_call_operand.vmem [shape: f32[8,1024], index: 0, kind: input, shape index: {}]   ;;  %s302_s1 = inlined_call_operand.vmem [shape: f32[8,1], index: 1, kind: input, shape index: {}]   ;;  %s303_s2 = inlined_call_operand.vmem [shape: f32[8,1], index: 2, kind: input, shape index: {}]   ;;  %s304_s3 = inlined_call_operand.vmem [shape: f32[8,1024], index: 3, kind: output, shape index: {}]  }
   0x1 LB: > { %s236_s13 = sadd.s32 4294967295, %s261_s12   ;;  %p240_p0 = scmp.ge.s32.totalorder %s261_s12, 1  ;;  %s261_s12 = sphi %s284_s12, %s13_s12  }
   0x2   : > { %p136_p1 = scmp.lt.s32.totalorder %s261_s12, 9 }
   0x4   : > { %p137_p2 = pnand %p240_p0, %p136_p1 }
   0x5   : > { %p158_p3 = scmp.lt.s32.totalorder (!%p137_p2), %s236_s13, 7 }
   0x6   : > { %140 = sbr.rel (%p137_p2) target bundleno = 141 (0x8d), region = 32 }
   0xb   : > { %v167_v0 = vld [vmem:[%s302_s1] sm:$0xff]  ;;  %v263_v1 = vmov 0   ;;  %s306_s13 = smov (!%p158_p3, %s236_s13), 7 }
   0xc   : > { %254 = vset.pattern.permute.xlu0 %v263_v1  ;;  %v174_v2 = vld [vmem:[%s303_s2] sm:$0xff]  ;;  %s241_s18 = sshll.u32 %s306_s13, 3 }
   0xd   : > { %170 = vperm.xlu0 %254, %v167_v0   ;;  %s161_s21 = scalar_lea.vmem %s301_s0, %s241_s18  ;;  %s165_s24 = scalar_lea.vmem %s304_s3, %s241_s18 }
   0xe   : > { %v166_v4 = vld [vmem:[%s161_s21] sm:$0xff] }
  0x15   : > { %177 = vperm.xlu0 %254, %v174_v2  }
  0x7f   : > { %v171_v3 = vpop.permute.xlu0 %170 }
  0x80   : > { %v173_v5 = vmul.f32 %v171_v3, %v166_v4 }
  0x87   : > { %v178_v6 = vpop.permute.xlu0 %177 }
  0x88   : > { %v180_v7 = vadd.f32 %v178_v6, %v173_v5 }
  0x8a   : > { %v181_v8 = vmax.f32 %v180_v7, 0.0 }
  0x8c   : > { %182 = vst [vmem:[%s165_s24] sm:$0xff] %v181_v8 }
  0x8d PF: > { %s13_s12 = sadd.s32 1, %s261_s12  }
  0x8e   : > { %p10_p4 = scmp.ge.s32.totalorder %s13_s12, 10  }
  0x90   :  { %12 = sbr.rel (!%p10_p4) target bundleno = 1 (0x1), region = 62 }

// kernel: dual_dilated_block_forward.25
= control target key start
LH: loop header
LB: loop body
LE: loop exit
PB: predicated region body
PF: predicated region fallthrough
CT: control target
= control target key end

     0   :  { %s285_s12 = smov 0   ;;  %s308_s0 = inlined_call_operand.vmem [shape: f32[8,1024], index: 0, kind: input, shape index: {}]   ;;  %s309_s1 = inlined_call_operand.vmem [shape: f32[8,1], index: 1, kind: input, shape index: {}]   ;;  %s310_s2 = inlined_call_operand.vmem [shape: f32[8,1], index: 2, kind: input, shape index: {}]   ;;  %s311_s3 = inlined_call_operand.vmem [shape: bf16[8,1024], index: 3, kind: output, shape index: {}]  }
   0x1 LB: > { %s237_s13 = sadd.s32 4294967295, %s262_s12   ;;  %p241_p0 = scmp.ge.s32.totalorder %s262_s12, 1  ;;  %s262_s12 = sphi %s285_s12, %s13_s12  }
   0x2   : > { %p136_p1 = scmp.lt.s32.totalorder %s262_s12, 9 }
   0x4   : > { %p137_p2 = pnand %p241_p0, %p136_p1 }
   0x5   : > { %p158_p3 = scmp.lt.s32.totalorder (!%p137_p2), %s237_s13, 7 }
   0x6   : > { %140 = sbr.rel (%p137_p2) target bundleno = 143 (0x8f), region = 32 }
   0xb   : > { %v167_v0 = vld [vmem:[%s309_s1] sm:$0xff]  ;;  %v264_v1 = vmov 0   ;;  %s313_s13 = smov (!%p158_p3, %s237_s13), 7 }
   0xc   : > { %255 = vset.pattern.permute.xlu0 %v264_v1  ;;  %v174_v2 = vld [vmem:[%s310_s2] sm:$0xff]  ;;  %s242_s18 = sshll.u32 %s313_s13, 3  ;;  %s243_s22 = sshll.u32 %s313_s13, 2 }
   0xd   : > { %170 = vperm.xlu0 %255, %v167_v0   ;;  %s161_s21 = scalar_lea.vmem %s308_s0, %s242_s18  ;;  %s165_s25 = scalar_lea.vmem %s311_s3, %s243_s22 }
   0xe   : > { %v166_v4 = vld [vmem:[%s161_s21] sm:$0xff] }
  0x15   : > { %177 = vperm.xlu0 %255, %v174_v2  }
  0x7f   : > { %v171_v3 = vpop.permute.xlu0 %170 }
  0x80   : > { %v173_v5 = vmul.f32 %v171_v3, %v166_v4 }
  0x87   : > { %v178_v6 = vpop.permute.xlu0 %177 }
  0x88   : > { %v180_v7 = vadd.f32 %v178_v6, %v173_v5 }
  0x8a   : > { %v181_v8 = vmax.f32 %v180_v7, 0.0 }
  0x8c   : > { %v182_v9 = vpack.c.bf16 %v181_v8, %v181_v8 }
  0x8e   : > { %183 = vst [vmem:[%s165_s25] sm:$0xf] %v182_v9 }
  0x8f PF: > { %s13_s12 = sadd.s32 1, %s262_s12  }
  0x90   : > { %p10_p4 = scmp.ge.s32.totalorder %s13_s12, 10  }
  0x92   :  { %12 = sbr.rel (!%p10_p4) target bundleno = 1 (0x1), region = 62 }

// kernel: dual_dilated_block_forward.24
= control target key start
LH: loop header
LB: loop body
LE: loop exit
PB: predicated region body
PF: predicated region fallthrough
CT: control target
= control target key end

     0   :  { %s773_s18 = smov 0   ;;  %s775_s19 = smov 0   ;;  %s929_s0 = inlined_call_operand.vmem [shape: bf16[216,1024], index: 0, kind: input, shape index: {}]   ;;  %s930_s1 = inlined_call_operand.vmem [shape: bf16[8,216], index: 1, kind: input, shape index: {}]   ;;  %s931_s2 = inlined_call_operand.vmem [shape: f32[8,1], index: 2, kind: input, shape index: {}]   ;;  %s932_s3 = inlined_call_operand.vmem [shape: f32[8,1024], index: 3, kind: output, shape index: {0}]   ;;  %s933_s4 = inlined_call_operand.vmem [shape: f32[8,1], index: 4, kind: output, shape index: {1}]   ;;  %s934_s5 = inlined_call_operand.vmem [shape: f32[8,1], index: 5, kind: output, shape index: {2}]  }
   0x1   :  { %s777_s20 = smov 0  }
   0x2 LB: > { %s789_s21 = sadd.s32 4294967295, %s739_s20   ;;  %s792_s22 = sadd.s32 1, %s739_s20   ;;  %s739_s20 = sphi %s777_s20, %s937_s20   ;;  %s735_s19 = sphi %s775_s19, %s936_s19   ;;  %s731_s18 = sphi %s773_s18, %s935_s18  }
   0x3   : > { %s20_s23 = ssub.s32 %s739_s20, %s792_s22  ;;  %s23_s24 = sadd.s32 1, %s735_s19 }
   0x4   : > { %p21_p0 = scmp.eq.s32.totalorder %s20_s23, 0  ;;  %p30_p1 = scmp.ne.s32.totalorder %s735_s19, %s731_s18 }
   0x5   : > { %p31_p2 = scmp.eq.s32.totalorder %s739_s20, 0  ;;  %p615_p4 = scmp.ge.s32.totalorder %s739_s20, 8 }
   0x6   : > { %s801_s25 = scalar_select %p21_p0, %s735_s19, %s23_s24  }
   0x7   : > { %p32_p3 = por %p31_p2, %p30_p1  ;;  %172 = sbr.rel (%p615_p4) target bundleno = 43 (0x2b), region = 24 }
   0xc   : > { %175 = sbr.rel (!%p32_p3) target bundleno = 43 (0x2b), region = 28  ;;  %s177_s26 = sand.u32 (%p32_p3), 1, %s735_s19  }
   0xd   : > { %s616_s27 = sshll.u32 (%p32_p3), %s739_s20, 2  ;;  %s688_s28 = smul.u32 (%p32_p3), 108, %s177_s26 }
   0xe   : > { %s809_s6 = scalar_lea.vmem (%p32_p3), %s929_s0, %s616_s27 }
   0xf   : > { %v198_v0 = vld [vmem:[%s809_s6] sm:$0xf] (%p32_p3)  ;;  %s814_s7 = scalar_lea.vmem (%p32_p3), [#allocation2], %s688_s28 }
  0x10   : > { %v200_v1 = vld [vmem:[%s809_s6 + $0x20] sm:$0xf] (%p32_p3)  ;;  %199 = vst [vmem:[%s814_s7] sm:$0xf] (%p32_p3), %v198_v0 }
  0x11   : > { %v202_v2 = vld [vmem:[%s809_s6 + $0x40] sm:$0xf]  ;;  %201 = vst [vmem:[%s814_s7 + $0x4] sm:$0xf] %v200_v1 }
  0x12   : > { %v204_v3 = vld [vmem:[%s809_s6 + $0x60] sm:$0xf]  ;;  %203 = vst [vmem:[%s814_s7 + $0x8] sm:$0xf] %v202_v2 }
  0x13   : > { %v206_v4 = vld [vmem:[%s809_s6 + $0x80] sm:$0xf]  ;;  %205 = vst [vmem:[%s814_s7 + $0xc] sm:$0xf] %v204_v3 }
  0x14   : > { %v208_v5 = vld [vmem:[%s809_s6 + $0xa0] sm:$0xf]  ;;  %207 = vst [vmem:[%s814_s7 + $0x10] sm:$0xf] %v206_v4 }
  0x15   : > { %v210_v6 = vld [vmem:[%s809_s6 + $0xc0] sm:$0xf]  ;;  %209 = vst [vmem:[%s814_s7 + $0x14] sm:$0xf] %v208_v5 }
  0x16   : > { %v212_v7 = vld [vmem:[%s809_s6 + $0xe0] sm:$0xf]  ;;  %211 = vst [vmem:[%s814_s7 + $0x18] sm:$0xf] %v210_v6 }
  0x17   : > { %v214_v8 = vld [vmem:[%s809_s6 + $0x100] sm:$0xf]  ;;  %213 = vst [vmem:[%s814_s7 + $0x1c] sm:$0xf] %v212_v7 }
  0x18   : > { %v216_v9 = vld [vmem:[%s809_s6 + $0x120] sm:$0xf]  ;;  %215 = vst [vmem:[%s814_s7 + $0x20] sm:$0xf] %v214_v8 }
  0x19   : > { %v218_v10 = vld [vmem:[%s809_s6 + $0x140] sm:$0xf]  ;;  %217 = vst [vmem:[%s814_s7 + $0x24] sm:$0xf] %v216_v9 }
  0x1a   : > { %v220_v11 = vld [vmem:[%s809_s6 + $0x160] sm:$0xf]  ;;  %219 = vst [vmem:[%s814_s7 + $0x28] sm:$0xf] %v218_v10 }
  0x1b   : > { %v222_v12 = vld [vmem:[%s809_s6 + $0x180] sm:$0xf]  ;;  %221 = vst [vmem:[%s814_s7 + $0x2c] sm:$0xf] %v220_v11 }
  0x1c   : > { %v224_v13 = vld [vmem:[%s809_s6 + $0x1a0] sm:$0xf]  ;;  %223 = vst [vmem:[%s814_s7 + $0x30] sm:$0xf] %v222_v12 }
  0x1d   : > { %v226_v14 = vld [vmem:[%s809_s6 + $0x1c0] sm:$0xf]  ;;  %225 = vst [vmem:[%s814_s7 + $0x34] sm:$0xf] %v224_v13 }
  0x1e   : > { %v228_v15 = vld [vmem:[%s809_s6 + $0x1e0] sm:$0xf]  ;;  %227 = vst [vmem:[%s814_s7 + $0x38] sm:$0xf] %v226_v14 }
  0x1f   : > { %v230_v16 = vld [vmem:[%s809_s6 + $0x200] sm:$0xf]  ;;  %229 = vst [vmem:[%s814_s7 + $0x3c] sm:$0xf] %v228_v15 }
  0x20   : > { %v232_v17 = vld [vmem:[%s809_s6 + $0x220] sm:$0xf]  ;;  %231 = vst [vmem:[%s814_s7 + $0x40] sm:$0xf] %v230_v16 }
  0x21   : > { %v234_v18 = vld [vmem:[%s809_s6 + $0x240] sm:$0xf]  ;;  %233 = vst [vmem:[%s814_s7 + $0x44] sm:$0xf] %v232_v17 }
  0x22   : > { %v236_v19 = vld [vmem:[%s809_s6 + $0x260] sm:$0xf]  ;;  %235 = vst [vmem:[%s814_s7 + $0x48] sm:$0xf] %v234_v18 }
  0x23   : > { %v238_v20 = vld [vmem:[%s809_s6 + $0x280] sm:$0xf]  ;;  %237 = vst [vmem:[%s814_s7 + $0x4c] sm:$0xf] %v236_v19 }
  0x24   : > { %v240_v21 = vld [vmem:[%s809_s6 + $0x2a0] sm:$0xf]  ;;  %239 = vst [vmem:[%s814_s7 + $0x50] sm:$0xf] %v238_v20 }
  0x25   : > { %v242_v22 = vld [vmem:[%s809_s6 + $0x2c0] sm:$0xf]  ;;  %241 = vst [vmem:[%s814_s7 + $0x54] sm:$0xf] %v240_v21 }
  0x26   : > { %v244_v23 = vld [vmem:[%s809_s6 + $0x2e0] sm:$0xf]  ;;  %243 = vst [vmem:[%s814_s7 + $0x58] sm:$0xf] %v242_v22 }
  0x27   : > { %v246_v24 = vld [vmem:[%s809_s6 + $0x300] sm:$0xf]  ;;  %245 = vst [vmem:[%s814_s7 + $0x5c] sm:$0xf] %v244_v23 }
  0x28   : > { %v248_v25 = vld [vmem:[%s809_s6 + $0x320] sm:$0xf]  ;;  %247 = vst [vmem:[%s814_s7 + $0x60] sm:$0xf] %v246_v24 }
  0x29   : > { %v250_v26 = vld [vmem:[%s809_s6 + $0x340] sm:$0xf]  ;;  %249 = vst [vmem:[%s814_s7 + $0x64] sm:$0xf] %v248_v25 }
  0x2a   : > { %251 = vst [vmem:[%s814_s7 + $0x68] sm:$0xf] %v250_v26 }
  0x2b PF: > { %p617_p5 = scmp.ge.s32.totalorder %s739_s20, 1  ;;  %p328_p6 = scmp.lt.s32.totalorder %s739_s20, 9 }
  0x2d   : > { %p329_p7 = pnand %p617_p5, %p328_p6 }
  0x2e   : > { %s335_s8 = sand.u32 (!%p329_p7), 1, %s731_s18   ;;  %p361_p8 = scmp.lt.s32.totalorder (!%p329_p7), %s789_s21, 7 }
  0x2f   : > { %332 = sbr.rel (%p329_p7) target bundleno = 344 (0x158), region = 69  ;;  %p619_p9 = scmp.ne.s32.totalorder (!%p329_p7), %s789_s21, 0 }
  0x30   : > { %s689_s9 = smul.u32 (!%p329_p7), 108, %s335_s8 }
  0x32   : > { %s877_s15 = scalar_lea.vmem (!%p329_p7), [#allocation2], %s689_s9 }
  0x34   : > { %s362_s10 = scalar_select %p361_p8, %s789_s21, 7 }
  0x35   : > { %369 = sbr.rel (%p619_p9) target bundleno = 61 (0x3d), region = 77 }
  0x36   : > { %s618_s11 = sshll.u32 %s362_s10, 3 }
  0x37   : > { %s875_s14 = scalar_lea.vmem %s932_s3, %s618_s11 }
  0x3a   : > { %vm370_vm0 = vcmask 7168   ;;  %v741_v27 = vmov 0.0  }
  0x3b   : > { %371 = vst.msk [vmem:[%s933_s4] sm:$0xff] %vm370_vm0, %v741_v27 }
  0x3c   : > { %372 = vst.msk [vmem:[%s934_s5] sm:$0xff] %vm370_vm0, %v741_v27 }
  0x3d PF: > { %v682_v28 = vld [vmem:[%s877_s15 + $0x38] sm:$0xff]  ;;  %v400_v29 = vld [vmem:[%s877_s15 + $0x68] sm:$0xf]  ;;  %vm498_vm1 = vcmask 1043456   ;;  %v681_v31 = vld [vmem:[%s877_s15 + $0x30] sm:$0xff]  ;;  %v742_v32 = vmov 0  }
  0x3e   : > { %v466_v30 = vunpack.c.l.b16 %v400_v29  ;;  %502 = vmatpush.bf16.msra.mxu0 %v682_v28  ;;  %716 = vset.pattern.permute.xlu0 %v742_v32  ;;  %v401_v35 = vld [vmem:[%s931_s2] sm:$0xff]  ;;  %v680_v37 = vld [vmem:[%s877_s15 + $0x28] sm:$0xff]  ;;  %vm494_vm2 = vcmask 719872   ;;  %vm533_vm3 = vcmask 7168  }
  0x3f   : > { %v687_v36 = vld [vmem:[%s877_s15 + $0x60] sm:$0xff]  ;;  %404 = vperm.xlu0 %716, %v401_v35   ;;  %v686_v38 = vld [vmem:[%s877_s15 + $0x58] sm:$0xff]  ;;  %v685_v40 = vld [vmem:[%s877_s15 + $0x50] sm:$0xff] }
  0x40   : > { %v480_v33 = vpack.c.b16 %v466_v30, %v466_v30  ;;  %v679_v39 = vld [vmem:[%s877_s15 + $0x20] sm:$0xff]  ;;  %v678_v41 = vld [vmem:[%s877_s15 + $0x18] sm:$0xff]  ;;  %v684_v42 = vld [vmem:[%s877_s15 + $0x48] sm:$0xff] }
  0x41   : > { %v677_v43 = vld [vmem:[%s877_s15 + $0x10] sm:$0xff]  ;;  %v683_v46 = vld [vmem:[%s877_s15 + $0x40] sm:$0xff]  ;;  %v676_v47 = vld [vmem:[%s877_s15 + $0x8] sm:$0xff] }
  0x42   : > { %v500_v34 = vsel %vm498_vm1, %v480_v33, 0  ;;  %503 = vmatpush.bf16.msra.mxu0 %v681_v31  ;;  %v373_v44 = vld [vmem:[%s930_s1] sm:$0xff] }
  0x43   : > { %517 = vmatpush.bf16.msra.mxu1 %v500_v34  ;;  %v409_v45 = vunpack.c.h.b16 %v373_v44  ;;  %v408_v49 = vunpack.c.l.b16 %v373_v44  ;;  %v675_v50 = vld [vmem:[%s877_s15] sm:$0xff] }
  0x44   : > { %v529_v60 = vld [vmem:[%s933_s4] sm:$0xff] }
  0x45   : > { %v411_v48 = vpack.c.b16 %v409_v45, %v409_v45  ;;  %v410_v51 = vpack.c.b16 %v408_v49, %v408_v49  ;;  %v535_v62 = vld [vmem:[%s934_s5] sm:$0xff] }
  0x46   : > { %504 = vmatpush.bf16.msra.mxu0 %v680_v37 }
  0x47   : > { %518 = vmatpush.bf16.msra.mxu1 %v687_v36 }
  0x4a   : > { %505 = vmatpush.bf16.msra.mxu0 %v679_v39 }
  0x4b   : > { %519 = vmatpush.bf16.msra.mxu1 %v686_v38 }
  0x4e   : > { %506 = vmatpush.bf16.msra.mxu0 %v678_v41 }
  0x4f   : > { %520 = vmatpush.bf16.msra.mxu1 %v685_v40 }
  0x52   : > { %507 = vmatpush.bf16.msra.mxu0 %v677_v43 }
  0x53   : > { %521 = vmatpush.bf16.msra.mxu1 %v684_v42 }
  0x56   : > { %508 = vmatpush.bf16.msra.mxu0 %v676_v47 }
  0x57   : > { %522 = vmatpush.bf16.msra.mxu1 %v683_v46 }
  0x5a   : > { %672 = vmatmul.msk.bf16.vlgmr.msra.gmra.mxu1 %vm494_vm2, %v411_v48  ;;  %509 = vmatpush.bf16.msra.mxu0 %v675_v50 }
  0x5d   : > { %510 = vmatmul.bf16.vlgmr.msra.gmra.mxu0 %v410_v51 }
  0xb1   : > { %v405_v53 = vpop.permute.xlu0 %404 }
  0xd7   : > { %v524_v52 = vpop.f32.mrf.mxu1 }
  0xda   : > { %v511_v54 = vpop.f32.mrf.mxu0 }
  0xdb   : > { %v512_v55 = vadd.f32 %v511_v54, %v405_v53 }
  0xdd   : > { %v525_v56 = vadd.f32 %v524_v52, %v512_v55 }
  0xdf   : > { %v526_v57 = vpop.f32.mrf.mxu1  ;;  %528 = vst [vmem:[%s875_s14] sm:$0xff] %v525_v56  ;;  %530 = vadd.xlane.f32.xlu0 %v525_v56  ;;  %v536_v58 = vmul.f32 %v525_v56, %v525_v56 }
  0xe1   : > { %537 = vadd.xlane.f32.xlu1 %v536_v58 }
  0xe2   : > { %v513_v59 = vpop.f32.mrf.mxu0 }
 0x152   : > { %v531_v61 = vpop.xlane.xlu0 %530 }
 0x153   : > { %v532_v63 = vadd.f32 %v531_v61, %v529_v60 }
 0x154   : > { %v538_v0 = vpop.xlane.xlu1 %537 }
 0x155   : > { %534 = vst.msk [vmem:[%s933_s4] sm:$0xff] %vm533_vm3, %v532_v63  ;;  %v539_v1 = vadd.f32 %v538_v0, %v535_v62 }
 0x157   : > { %540 = vst.msk [vmem:[%s934_s5] sm:$0xff] %vm533_vm3, %v539_v1 }
 0x158 PF: > { %p13_p10 = scmp.ge.s32.totalorder %s792_s22, 10   ;;  %s935_s18 = smov %s735_s19 }
 0x159   : > { %s936_s19 = smov %s801_s25  ;;  %s937_s20 = smov %s792_s22 }
 0x15a   :  { %15 = sbr.rel (!%p13_p10) target bundleno = 2 (0x2), region = 128 }

// kernel: dual_dilated_block_forward.15
= control target key start
LH: loop header
LB: loop body
LE: loop exit
PB: predicated region body
PF: predicated region fallthrough
CT: control target
= control target key end

     0   :  { %s300_s12 = smov 0   ;;  %s323_s0 = inlined_call_operand.vmem [shape: f32[8,1024], index: 0, kind: input, shape index: {}]   ;;  %s324_s1 = inlined_call_operand.vmem [shape: f32[8,1], index: 1, kind: input, shape index: {}]   ;;  %s325_s2 = inlined_call_operand.vmem [shape: f32[8,1], index: 2, kind: input, shape index: {}]   ;;  %s326_s3 = inlined_call_operand.vmem [shape: f32[8,1024], index: 3, kind: output, shape index: {}]  }
   0x1 LB: > { %s246_s13 = sadd.s32 4294967295, %s277_s12   ;;  %p250_p0 = scmp.ge.s32.totalorder %s277_s12, 1  ;;  %s277_s12 = sphi %s300_s12, %s13_s12  }
   0x2   : > { %p136_p1 = scmp.lt.s32.totalorder %s277_s12, 9 }
   0x4   : > { %p137_p2 = pnand %p250_p0, %p136_p1 }
   0x5   : > { %p158_p3 = scmp.lt.s32.totalorder (!%p137_p2), %s246_s13, 7 }
   0x6   : > { %140 = sbr.rel (%p137_p2) target bundleno = 174 (0xae), region = 32 }
   0xb   : > { %v167_v0 = vld [vmem:[%s324_s1] sm:$0xff]  ;;  %v279_v1 = vmov 0   ;;  %s328_s13 = smov (!%p158_p3, %s246_s13), 7 }
   0xc   : > { %264 = vset.pattern.permute.xlu0 %v279_v1  ;;  %v174_v2 = vld [vmem:[%s325_s2] sm:$0xff]  ;;  %s251_s18 = sshll.u32 %s328_s13, 3 }
   0xd   : > { %170 = vperm.xlu0 %264, %v167_v0   ;;  %s161_s21 = scalar_lea.vmem %s323_s0, %s251_s18  ;;  %s165_s24 = scalar_lea.vmem %s326_s3, %s251_s18 }
   0xe   : > { %v166_v4 = vld [vmem:[%s161_s21] sm:$0xff] }
  0x15   : > { %177 = vperm.xlu0 %264, %v174_v2  }
  0x7f   : > { %v171_v3 = vpop.permute.xlu0 %170 }
  0x80   : > { %v173_v5 = vmul.f32 %v171_v3, %v166_v4 }
  0x87   : > { %v178_v6 = vpop.permute.xlu0 %177 }
  0x88   : > { %v180_v7 = vadd.f32 %v178_v6, %v173_v5 }
  0x8a   : > { %v182_v8 = vand.u32 2147483647, %v180_v7  ;;  %v181_v14 = vmax.f32 %v180_v7, 0.0 }
  0x8c   : > { %v183_v9 = vsub.f32 0.0, %v182_v8 }
  0x8e   : > { %v184_v10 = vmul.f32 1.442695, %v183_v9 }
  0x90   : > { %265 = vpow2.f32 %v184_v10 }
  0x96   : > { %v266_v11 = vpop.eup %265 }
  0x97   : > { %v186_v12 = vadd.f32 1.0, %v266_v11 }
  0x99   : > { %267 = vlog2.f32 %v186_v12 }
  0x9f   : > { %v268_v13 = vpop.eup %267 }
  0xa0   : > { %v188_v15 = vmul.f32 0.6931472, %v268_v13 }
  0xa2   : > { %v189_v16 = vadd.f32 %v188_v15, %v181_v14 }
  0xa4   : > { %269 = vtanh.f32 %v189_v16 }
  0xaa   : > { %v270_v17 = vpop.eup %269 }
  0xab   : > { %v191_v18 = vmul.f32 %v270_v17, %v180_v7 }
  0xad   : > { %192 = vst [vmem:[%s165_s24] sm:$0xff] %v191_v18 }
  0xae PF: > { %s13_s12 = sadd.s32 1, %s277_s12  }
  0xaf   : > { %p10_p4 = scmp.ge.s32.totalorder %s13_s12, 10  }
  0xb1   :  { %12 = sbr.rel (!%p10_p4) target bundleno = 1 (0x1), region = 62 }

// kernel: dual_dilated_block_forward.17
= control target key start
LH: loop header
LB: loop body
LE: loop exit
PB: predicated region body
PF: predicated region fallthrough
CT: control target
= control target key end

     0   :  { %s301_s12 = smov 0   ;;  %s324_s0 = inlined_call_operand.vmem [shape: f32[8,1024], index: 0, kind: input, shape index: {}]   ;;  %s325_s1 = inlined_call_operand.vmem [shape: f32[8,1], index: 1, kind: input, shape index: {}]   ;;  %s326_s2 = inlined_call_operand.vmem [shape: f32[8,1], index: 2, kind: input, shape index: {}]   ;;  %s327_s3 = inlined_call_operand.vmem [shape: bf16[8,1024], index: 3, kind: output, shape index: {}]  }
   0x1 LB: > { %s247_s13 = sadd.s32 4294967295, %s278_s12   ;;  %p251_p0 = scmp.ge.s32.totalorder %s278_s12, 1  ;;  %s278_s12 = sphi %s301_s12, %s13_s12  }
   0x2   : > { %p136_p1 = scmp.lt.s32.totalorder %s278_s12, 9 }
   0x4   : > { %p137_p2 = pnand %p251_p0, %p136_p1 }
   0x5   : > { %p158_p3 = scmp.lt.s32.totalorder (!%p137_p2), %s247_s13, 7 }
   0x6   : > { %140 = sbr.rel (%p137_p2) target bundleno = 176 (0xb0), region = 32 }
   0xb   : > { %v167_v0 = vld [vmem:[%s325_s1] sm:$0xff]  ;;  %v280_v1 = vmov 0   ;;  %s329_s13 = smov (!%p158_p3, %s247_s13), 7 }
   0xc   : > { %265 = vset.pattern.permute.xlu0 %v280_v1  ;;  %v174_v2 = vld [vmem:[%s326_s2] sm:$0xff]  ;;  %s252_s18 = sshll.u32 %s329_s13, 3  ;;  %s253_s22 = sshll.u32 %s329_s13, 2 }
   0xd   : > { %170 = vperm.xlu0 %265, %v167_v0   ;;  %s161_s21 = scalar_lea.vmem %s324_s0, %s252_s18  ;;  %s165_s25 = scalar_lea.vmem %s327_s3, %s253_s22 }
   0xe   : > { %v166_v4 = vld [vmem:[%s161_s21] sm:$0xff] }
  0x15   : > { %177 = vperm.xlu0 %265, %v174_v2  }
  0x7f   : > { %v171_v3 = vpop.permute.xlu0 %170 }
  0x80   : > { %v173_v5 = vmul.f32 %v171_v3, %v166_v4 }
  0x87   : > { %v178_v6 = vpop.permute.xlu0 %177 }
  0x88   : > { %v180_v7 = vadd.f32 %v178_v6, %v173_v5 }
  0x8a   : > { %v182_v8 = vand.u32 2147483647, %v180_v7  ;;  %v181_v14 = vmax.f32 %v180_v7, 0.0 }
  0x8c   : > { %v183_v9 = vsub.f32 0.0, %v182_v8 }
  0x8e   : > { %v184_v10 = vmul.f32 1.442695, %v183_v9 }
  0x90   : > { %266 = vpow2.f32 %v184_v10 }
  0x96   : > { %v267_v11 = vpop.eup %266 }
  0x97   : > { %v186_v12 = vadd.f32 1.0, %v267_v11 }
  0x99   : > { %268 = vlog2.f32 %v186_v12 }
  0x9f   : > { %v269_v13 = vpop.eup %268 }
  0xa0   : > { %v188_v15 = vmul.f32 0.6931472, %v269_v13 }
  0xa2   : > { %v189_v16 = vadd.f32 %v188_v15, %v181_v14 }
  0xa4   : > { %270 = vtanh.f32 %v189_v16 }
  0xaa   : > { %v271_v17 = vpop.eup %270 }
  0xab   : > { %v191_v18 = vmul.f32 %v271_v17, %v180_v7 }
  0xad   : > { %v192_v19 = vpack.c.bf16 %v191_v18, %v191_v18 }
  0xaf   : > { %193 = vst [vmem:[%s165_s25] sm:$0xf] %v192_v19 }
  0xb0 PF: > { %s13_s12 = sadd.s32 1, %s278_s12  }
  0xb1   : > { %p10_p4 = scmp.ge.s32.totalorder %s13_s12, 10  }
  0xb3   :  { %12 = sbr.rel (!%p10_p4) target bundleno = 1 (0x1), region = 62 }

// kernel: dual_dilated_block_forward.26
= control target key start
LH: loop header
LB: loop body
LE: loop exit
PB: predicated region body
PF: predicated region fallthrough
CT: control target
= control target key end

     0   :  { %s626_s30 = smov 0   ;;  %s682_s0 = inlined_call_operand.vmem [shape: bf16[8,1024], index: 0, kind: input, shape index: {}]   ;;  %s683_s1 = inlined_call_operand.vmem [shape: bf16[8,1024], index: 1, kind: input, shape index: {}]   ;;  %s684_s2 = inlined_call_operand.vmem [shape: bf16[8,1024], index: 2, kind: input, shape index: {}]   ;;  %s685_s3 = inlined_call_operand.vmem [shape: bf16[8,8], index: 3, kind: input, shape index: {}]   ;;  %s686_s4 = inlined_call_operand.vmem [shape: bf16[8,8], index: 4, kind: input, shape index: {}]   ;;  %s687_s5 = inlined_call_operand.vmem [shape: bf16[8,8], index: 5, kind: input, shape index: {}]   ;;  %s688_s6 = inlined_call_operand.vmem [shape: f32[8,1], index: 6, kind: input, shape index: {}]   ;;  %s689_s7 = inlined_call_operand.vmem [shape: f32[8,1024], index: 7, kind: output, shape index: {0}]   ;;  %s690_s8 = inlined_call_operand.vmem [shape: f32[8,1], index: 8, kind: output, shape index: {1}]   ;;  %s691_s9 = inlined_call_operand.vmem [shape: f32[8,1], index: 9, kind: output, shape index: {2}]  }
   0x1 LB: > { %s540_s10 = sadd.s32 4294967295, %s572_s30   ;;  %p544_p0 = scmp.ge.s32.totalorder %s572_s30, 1  ;;  %s572_s30 = sphi %s626_s30, %s20_s30  }
   0x2   : > { %p299_p1 = scmp.lt.s32.totalorder %s572_s30, 9 }
   0x4   : > { %p300_p2 = pnand %p544_p0, %p299_p1 }
   0x5   : > { %p341_p3 = scmp.lt.s32.totalorder (!%p300_p2), %s540_s10, 7  ;;  %p549_p4 = scmp.ne.s32.totalorder (!%p300_p2), %s540_s10, 0 }
   0x6   : > { %303 = sbr.rel (%p300_p2) target bundleno = 284 (0x11c), region = 48 }
   0xb   : > { %s342_s11 = scalar_select %p341_p3, %s540_s10, 7 }
   0xc   : > { %361 = sbr.rel (%p549_p4) target bundleno = 20 (0x14), region = 52 }
   0xd   : > { %s545_s12 = sshll.u32 %s342_s11, 2  ;;  %s548_s13 = sshll.u32 %s342_s11, 3 }
   0xe   : > { %s344_s16 = scalar_lea.vmem %s682_s0, %s545_s12  ;;  %s348_s19 = scalar_lea.vmem %s683_s1, %s545_s12 }
   0xf   : > { %s352_s22 = scalar_lea.vmem %s684_s2, %s545_s12  ;;  %s646_s25 = scalar_lea.vmem %s689_s7, %s548_s13 }
  0x11   : > { %vm362_vm0 = vcmask 7168   ;;  %v574_v0 = vmov 0.0  }
  0x12   : > { %363 = vst.msk [vmem:[%s690_s8] sm:$0xff] %vm362_vm0, %v574_v0 }
  0x13   : > { %364 = vst.msk [vmem:[%s691_s9] sm:$0xff] %vm362_vm0, %v574_v0 }
  0x14 PF: > { %v368_v1 = vld [vmem:[%s348_s19] sm:$0xf]  ;;  %vm373_vm1 = vcmask 1043456   ;;  %vm369_vm2 = vcmask 64512   ;;  %v575_v10 = vmov 0   ;;  %vm443_vm3 = vcmask 7168  }
  0x15   : > { %v366_v2 = vld [vmem:[%s344_s16] sm:$0xf]  ;;  %v375_v3 = vsel %vm373_vm1, %v368_v1, 0  ;;  %565 = vset.pattern.permute.xlu0 %v575_v10 }
  0x16   : > { %v394_v4 = vsel %vm373_vm1, %v366_v2, 0  ;;  %v410_v5 = vld [vmem:[%s352_s22] sm:$0xf]  ;;  %384 = vmatpush.bf16.msra.mxu0 %v375_v3 }
  0x17   : > { %403 = vmatpush.bf16.msra.mxu1 %v394_v4  ;;  %v415_v6 = vsel %vm373_vm1, %v410_v5, 0  ;;  %v367_v7 = vld [vmem:[%s686_s4] sm:$0xf] }
  0x18   : > { %v365_v8 = vld [vmem:[%s685_s3] sm:$0xf]  ;;  %424 = vmatpush.bf16.msra.mxu2 %v415_v6 }
  0x19   : > { %v409_v9 = vld [vmem:[%s687_s5] sm:$0xf]  ;;  %550 = vmatmul.msk.bf16.vlgmr.msra.gmra.mxu0 %vm369_vm2, %v367_v7 }
  0x1a   : > { %v431_v11 = vld [vmem:[%s688_s6] sm:$0xff]  ;;  %551 = vmatmul.msk.bf16.vlgmr.msra.gmra.mxu1 %vm369_vm2, %v365_v8 }
  0x1b   : > { %434 = vperm.xlu0 %565, %v431_v11   ;;  %552 = vmatmul.msk.bf16.vlgmr.msra.gmra.mxu2 %vm369_vm2, %v409_v9  ;;  %v439_v23 = vld [vmem:[%s690_s8] sm:$0xff] }
  0x1c   : > { %v445_v25 = vld [vmem:[%s691_s9] sm:$0xff] }
  0x8d   : > { %v435_v16 = vpop.permute.xlu0 %434 }
  0x96   : > { %v386_v12 = vpop.f32.mrf.mxu0 }
  0x97   : > { %v405_v13 = vpop.f32.mrf.mxu1 }
  0x98   : > { %v406_v14 = vadd.f32 %v405_v13, %v386_v12 }
  0x9e   : > { %v426_v15 = vpop.f32.mrf.mxu2  ;;  %v388_v18 = vpop.f32.mrf.mxu0 }
  0x9f   : > { %v430_v17 = vadd.f32 %v426_v15, %v406_v14  ;;  %v407_v19 = vpop.f32.mrf.mxu1 }
  0xa1   : > { %v437_v20 = vadd.f32 %v435_v16, %v430_v17 }
  0xa3   : > { %438 = vst [vmem:[%s646_s25] sm:$0xff] %v437_v20  ;;  %440 = vadd.xlane.f32.xlu0 %v437_v20  ;;  %v446_v21 = vmul.f32 %v437_v20, %v437_v20 }
  0xa5   : > { %447 = vadd.xlane.f32.xlu1 %v446_v21 }
  0xa6   : > { %v428_v22 = vpop.f32.mrf.mxu2 }
 0x116   : > { %v441_v24 = vpop.xlane.xlu0 %440 }
 0x117   : > { %v442_v26 = vadd.f32 %v441_v24, %v439_v23 }
 0x118   : > { %v448_v27 = vpop.xlane.xlu1 %447 }
 0x119   : > { %444 = vst.msk [vmem:[%s690_s8] sm:$0xff] %vm443_vm3, %v442_v26  ;;  %v449_v28 = vadd.f32 %v448_v27, %v445_v25 }
 0x11b   : > { %450 = vst.msk [vmem:[%s691_s9] sm:$0xff] %vm443_vm3, %v449_v28 }
 0x11c PF: > { %s20_s30 = sadd.s32 1, %s572_s30  }
 0x11d   : > { %p17_p5 = scmp.ge.s32.totalorder %s20_s30, 10  }
 0x11f   :  { %19 = sbr.rel (!%p17_p5) target bundleno = 1 (0x1), region = 104 }

</bundles_post_ra>
